<compile_context>
chip_gen: v5e
topology: v5e:2x2
jax: 0.10.0
libtpu: 0.0.40
codegen_flags: <defaults>
</compile_context>

<pallas_src>
import functools

import jax
import jax.numpy as jnp
from jax.experimental import pallas as pl
from jax.experimental.pallas import tpu as pltpu

_VMEM_LIMIT = 32 * 1024 * 1024  # explicit scoped-VMEM budget; safe on v5e/v6e/v7x


# --------------------------------------------------------------------------
# helpers
# --------------------------------------------------------------------------
def _round_up(x, m):
    return (x + m - 1) // m * m


def _pad2d(x, rows, cols):
    r, c = x.shape
    if r == rows and c == cols:
        return x
    return jnp.pad(x, ((0, rows - r), (0, cols - c)))


# --------------------------------------------------------------------------
# Pallas kernel 1: tiled bf16 matmul with fused per-channel BN statistics
# --------------------------------------------------------------------------
def _matmul_stats_kernel(a_ref, b_ref, o_ref, sum_ref, sq_ref, acc_ref):
    @pl.when(pl.program_id(2) == 0)
    def _():
        acc_ref[...] = jnp.zeros_like(acc_ref)

    acc_ref[...] += jnp.dot(a_ref[...], b_ref[...],
                            preferred_element_type=jnp.float32)

    @pl.when(pl.program_id(2) == pl.num_programs(2) - 1)
    def _():
        acc = acc_ref[...]
        o_ref[...] = acc.astype(o_ref.dtype)
        s = jnp.sum(acc, axis=0, keepdims=True)
        q = jnp.sum(acc * acc, axis=0, keepdims=True)
        sum_ref[...] = jnp.broadcast_to(s, sum_ref.shape)
        sq_ref[...] = jnp.broadcast_to(q, sq_ref.shape)


def pallas_matmul(a, b, out_dtype=jnp.bfloat16):
    """C = A @ B on the MXU (bf16 operands, f32 accumulation), plus fused per-column
    sum / sum-of-squares (BatchNorm statistics) computed in the last-K epilogue."""
    M, K = a.shape
    _, N = b.shape
    a = a.astype(jnp.bfloat16)
    b = b.astype(jnp.bfloat16)

    tm = min(256, _round_up(M, 16))
    n128 = _round_up(N, 128)
    if _round_up(M, tm) // tm < 2 and n128 >= 256:
        tn = 128                 # keep >=2 blocks on a parallel axis (v7x megacore)
    else:
        tn = min(256, n128)
    tk = min(512, _round_up(K, 128))

    Mp, Kp, Np = _round_up(M, tm), _round_up(K, tk), _round_up(N, tn)
    a_p = _pad2d(a, Mp, Kp)
    b_p = _pad2d(b, Kp, Np)
    nmi = Mp // tm

    out, s, q = pl.pallas_call(
        _matmul_stats_kernel,
        out_shape=(jax.ShapeDtypeStruct((Mp, Np), out_dtype),
                   jax.ShapeDtypeStruct((8 * nmi, Np), jnp.float32),
                   jax.ShapeDtypeStruct((8 * nmi, Np), jnp.float32)),
        grid_spec=pltpu.PrefetchScalarGridSpec(
            num_scalar_prefetch=0,
            grid=(nmi, Np // tn, Kp // tk),
            in_specs=[pl.BlockSpec((tm, tk), lambda i, j, k: (i, k)),
                      pl.BlockSpec((tk, tn), lambda i, j, k: (k, j))],
            out_specs=(pl.BlockSpec((tm, tn), lambda i, j, k: (i, j)),
                       pl.BlockSpec((8, tn), lambda i, j, k: (i, j)),
                       pl.BlockSpec((8, tn), lambda i, j, k: (i, j))),
            scratch_shapes=[pltpu.VMEM((tm, tn), jnp.float32)]),
        compiler_params=pltpu.CompilerParams(
            dimension_semantics=("parallel", "parallel", "arbitrary"),
            vmem_limit_bytes=_VMEM_LIMIT),
    )(a_p, b_p)

    col_sum = jnp.sum(s, axis=0)[:N] / 8.0   # stat rows are replicated x8 per tile
    col_sq = jnp.sum(q, axis=0)[:N] / 8.0
    return out[:M, :N], col_sum, col_sq


# --------------------------------------------------------------------------
# Pallas kernel 2: fused BN affine (+ optional residual) (+ optional ReLU)
# --------------------------------------------------------------------------
def _bn_kernel(x_ref, scale_ref, shift_ref, o_ref, *, relu):
    y = x_ref[...].astype(jnp.float32) * scale_ref[...] + shift_ref[...]
    if relu:
        y = jnp.maximum(y, 0.0)
    o_ref[...] = y.astype(o_ref.dtype)


def _bn_res_kernel(x_ref, scale_ref, shift_ref, res_ref, o_ref, *, relu):
    y = (x_ref[...].astype(jnp.float32) * scale_ref[...] + shift_ref[...]
         + res_ref[...].astype(jnp.float32))
    if relu:
        y = jnp.maximum(y, 0.0)
    o_ref[...] = y.astype(o_ref.dtype)


def pallas_bn_apply(x, scale, shift, residual=None, relu=True):
    """y = x * scale + shift (+ residual) (+ ReLU). bf16 in/out, f32 math.
    Narrow channel counts (<128) are folded into a lane-dense last dim."""
    P, C = x.shape
    x = x.astype(jnp.bfloat16)

    fold = 1
    if C < 128 and 128 % C == 0 and P % (128 // C) == 0:
        fold = 128 // C
    Pf, Cf = P // fold, C * fold

    xf = x.reshape(Pf, Cf)
    sc = jnp.tile(scale.reshape(1, C).astype(jnp.float32), (1, fold))
    sh = jnp.tile(shift.reshape(1, C).astype(jnp.float32), (1, fold))

    tm = min(512, _round_up(Pf, 16))
    Pp = _round_up(Pf, tm)
    xf = _pad2d(xf, Pp, Cf)

    in_specs = [pl.BlockSpec((tm, Cf), lambda i: (i, 0)),
                pl.BlockSpec((1, Cf), lambda i: (0, 0)),
                pl.BlockSpec((1, Cf), lambda i: (0, 0))]
    args = [xf, sc, sh]
    if residual is None:
        kernel = functools.partial(_bn_kernel, relu=relu)
    else:
        rf = _pad2d(residual.astype(jnp.bfloat16).reshape(Pf, Cf), Pp, Cf)
        in_specs.append(pl.BlockSpec((tm, Cf), lambda i: (i, 0)))
        args.append(rf)
        kernel = functools.partial(_bn_res_kernel, relu=relu)

    out = pl.pallas_call(
        kernel,
        out_shape=jax.ShapeDtypeStruct((Pp, Cf), jnp.bfloat16),
        grid_spec=pltpu.PrefetchScalarGridSpec(
            num_scalar_prefetch=0,
            grid=(Pp // tm,),
            in_specs=in_specs,
            out_specs=pl.BlockSpec((tm, Cf), lambda i: (i, 0))),
        compiler_params=pltpu.CompilerParams(
            dimension_semantics=("parallel",),
            vmem_limit_bytes=_VMEM_LIMIT),
    )(*args)
    return out[:Pf].reshape(P, C)


# --------------------------------------------------------------------------
# BN scale/shift from the fused matmul statistics
# --------------------------------------------------------------------------
def bn_scale_shift(col_sum, col_sq, count, gamma, beta, eps=1e-5):
    mean = col_sum / count
    var = jnp.maximum(col_sq / count - mean * mean, 0.0)   # clamp f32 cancellation
    scale = gamma / jnp.sqrt(var + eps)
    shift = beta - mean * scale
    return scale, shift


def apply_bn_5d(y, stats, gamma, beta, residual=None, relu=True):
    scale, shift = bn_scale_shift(*stats, gamma, beta)
    shp = y.shape
    C = shp[-1]
    res2 = None if residual is None else residual.reshape(-1, C)
    out = pallas_bn_apply(y.reshape(-1, C), scale, shift, res2, relu)
    return out.reshape(shp)


# --------------------------------------------------------------------------
# Convolutions (im2col glue in plain JAX; matmul + BN stats in Pallas)
# --------------------------------------------------------------------------
def conv3d(x, w, stride=1):
    """x: (N,D,H,W,Cin) bf16, w: (k,k,k,Cin,Cout). SAME padding for odd k, no bias.
    Returns (y, (per-channel sum, sumsq, count)) with stats fused from the matmul."""
    k = w.shape[0]
    N, D, H, W, Cin = x.shape
    Cout = w.shape[-1]
    if k == 1:
        xs = x if stride == 1 else x[:, ::stride, ::stride, ::stride, :]
        _, Do, Ho, Wo, _ = xs.shape
        cols = xs.reshape(-1, Cin)
        wmat = w.reshape(Cin, Cout)
    else:
        # TODO(synk): im2col still materializes a (M, k^3*Cin) bf16 temp in HBM; fully
        # fusing the tap gather into the matmul index_map would remove this last pass.
        pad = k // 2
        xp = jnp.pad(x, ((0, 0), (pad, pad), (pad, pad), (pad, pad), (0, 0)))
        Do = (D + 2 * pad - k) // stride + 1
        Ho = (H + 2 * pad - k) // stride + 1
        Wo = (W + 2 * pad - k) // stride + 1
        patches = []
        for dz in range(k):
            for dy in range(k):
                for dx in range(k):
                    patches.append(xp[:, dz:dz + Do * stride:stride,
                                      dy:dy + Ho * stride:stride,
                                      dx:dx + Wo * stride:stride, :])
        cols = jnp.concatenate(patches, axis=-1).reshape(N * Do * Ho * Wo,
                                                         k * k * k * Cin)
        wmat = w.reshape(k * k * k * Cin, Cout)
    y2d, s, q = pallas_matmul(cols, wmat)
    y = y2d.reshape(N, Do, Ho, Wo, Cout)
    return y, (s, q, y2d.shape[0])


def conv3d_transpose2x_rows(rows, w):
    """k=2, s=2 transposed conv on flattened rows in blocked-row order.
    Each input voxel independently emits 8 output voxels, so the spatial interleave
    is pure row-order bookkeeping, deferred to the end of the decoder."""
    M, Cin = rows.shape
    Cout = w.shape[-1]
    wmat = jnp.transpose(w.reshape(8, Cin, Cout), (1, 0, 2)).reshape(Cin, 8 * Cout)
    y, s, q = pallas_matmul(rows, wmat)                     # (M, 8*Cout)
    s = jnp.sum(s.reshape(8, Cout), axis=0)
    q = jnp.sum(q.reshape(8, Cout), axis=0)
    return y.reshape(M * 8, Cout), (s, q, M * 8)


# --------------------------------------------------------------------------
# Parameter init (deterministic, in-script)
# --------------------------------------------------------------------------
def init_conv(key, k, cin, cout):
    std = (2.0 / (k ** 3 * cin)) ** 0.5
    return jax.random.normal(key, (k, k, k, cin, cout), jnp.float32) * std


def init_bn(key, c):
    k1, k2 = jax.random.split(key)
    gamma = 1.0 + 0.1 * jax.random.normal(k1, (c,), jnp.float32)
    beta = 0.1 * jax.random.normal(k2, (c,), jnp.float32)
    return gamma, beta


def init_minkunet34(key, in_channels, out_channels):
    keys = iter(jax.random.split(key, 256))
    params = {}
    params['conv1_w'] = init_conv(next(keys), 7, in_channels, 64)
    params['bn1'] = init_bn(next(keys), 64)

    inplanes = [64]

    def make_layer(planes, blocks, stride):
        layer = []
        for b in range(blocks):
            cin = inplanes[0] if b == 0 else planes
            s = stride if b == 0 else 1
            blk = {'stride': s,
                   'conv1': init_conv(next(keys), 3, cin, planes),
                   'bn1': init_bn(next(keys), planes),
                   'conv2': init_conv(next(keys), 3, planes, planes),
                   'bn2': init_bn(next(keys), planes)}
            if s != 1 or cin != planes:
                blk['down_conv'] = init_conv(next(keys), 1, cin, planes)
                blk['down_bn'] = init_bn(next(keys), planes)
            layer.append(blk)
        inplanes[0] = planes
        return layer

    params['layer1'] = make_layer(64, 3, 1)
    params['layer2'] = make_layer(128, 4, 2)
    params['layer3'] = make_layer(256, 6, 2)
    params['layer4'] = make_layer(512, 3, 2)

    params['conv2t_w'] = init_conv(next(keys), 2, 512, 256)
    params['bn2t'] = init_bn(next(keys), 256)
    params['conv3t_w'] = init_conv(next(keys), 2, 256, 128)
    params['bn3t'] = init_bn(next(keys), 128)
    params['conv4t_w'] = init_conv(next(keys), 2, 128, 64)
    params['bn4t'] = init_bn(next(keys), 64)
    params['conv5_w'] = init_conv(next(keys), 1, 64, out_channels)
    return params


# --------------------------------------------------------------------------
# Forward pass
# --------------------------------------------------------------------------
def basic_block_forward(x, blk):
    stride = blk['stride']
    out, st = conv3d(x, blk['conv1'], stride)
    out = apply_bn_5d(out, st, *blk['bn1'], relu=True)
    out, st = conv3d(out, blk['conv2'], 1)
    if 'down_conv' in blk:
        res, rst = conv3d(x, blk['down_conv'], stride)
        residual = apply_bn_5d(res, rst, *blk['down_bn'], relu=False)
    else:
        residual = x
    out = apply_bn_5d(out, st, *blk['bn2'], residual=residual, relu=True)
    return out


def minkunet34_forward(x_ncdhw, params):
    # NCDHW (PyTorch) -> NDHWC, bf16 activations (f32 accumulation inside kernels)
    x = jnp.transpose(x_ncdhw, (0, 2, 3, 4, 1)).astype(jnp.bfloat16)

    # stem: conv(k=7, s=2) + BN + ReLU
    x, st = conv3d(x, params['conv1_w'], stride=2)
    x = apply_bn_5d(x, st, *params['bn1'], relu=True)

    # residual stages
    for layer_name in ('layer1', 'layer2', 'layer3', 'layer4'):
        for blk in params[layer_name]:
            x = basic_block_forward(x, blk)

    # decoder: three (transposed conv k=2 s=2 + BN + ReLU) in blocked-row layout
    # (per-voxel ops; spatial interleave deferred to one final transpose)
    N, D4, H4, W4, C4 = x.shape
    rows = x.reshape(-1, C4)
    for wname, bname in (('conv2t_w', 'bn2t'), ('conv3t_w', 'bn3t'), ('conv4t_w', 'bn4t')):
        rows, st = conv3d_transpose2x_rows(rows, params[wname])
        scale, shift = bn_scale_shift(*st, *params[bname])
        rows = pallas_bn_apply(rows, scale, shift, relu=True)

    # final 1x1x1 conv (per-voxel)
    cout = params['conv5_w'].shape[-1]
    out2d, _, _ = pallas_matmul(rows, params['conv5_w'].reshape(rows.shape[1], cout))

    # unscramble blocked rows -> dense grid, NDHWC -> NCDHW, f32
    y = out2d.reshape(N, D4, H4, W4, 2, 2, 2, 2, 2, 2, 2, 2, 2, cout)
    y = jnp.transpose(y, (0, 13, 1, 4, 7, 10, 2, 5, 8, 11, 3, 6, 9, 12))
    return y.reshape(N, cout, 8 * D4, 8 * H4, 8 * W4).astype(jnp.float32)


# --------------------------------------------------------------------------
if __name__ == "__main__":
    key = jax.random.PRNGKey(0)
    kp, kx = jax.random.split(key)

    in_channels, out_channels = 4, 4
    batch, spatial = 2, 16  # small dense voxel grid

    params = init_minkunet34(kp, in_channels, out_channels)
    x = jax.random.normal(kx, (batch, in_channels, spatial, spatial, spatial), jnp.float32)

    y = minkunet34_forward(x, params)
    jax.block_until_ready(y)

    assert y.shape == (batch, out_channels, spatial // 2, spatial // 2, spatial // 2), y.shape
    assert bool(jnp.all(jnp.isfinite(y)))
    print("KERNEL_OK")
</pallas_src>

<mosaic_0001>
module attributes {stable_mosaic.version = 11 : i64} {
  func.func @_matmul_stats_kernel(%arg0: i32, %arg1: i32, %arg2: i32, %arg3: memref<256x512xbf16, #tpu.memory_space<vmem>>, %arg4: memref<512x128xbf16, #tpu.memory_space<vmem>>, %arg5: memref<256x128xbf16, #tpu.memory_space<vmem>>, %arg6: memref<8x128xf32, #tpu.memory_space<vmem>>, %arg7: memref<8x128xf32, #tpu.memory_space<vmem>>, %arg8: memref<256x128xf32, #tpu.memory_space<vmem>>) attributes {dimension_semantics = [#tpu.dimension_semantics<parallel>, #tpu.dimension_semantics<parallel>, #tpu.dimension_semantics<arbitrary>], iteration_bounds = array<i64: 4, 1, 3>, scalar_prefetch = 0 : i64, scratch_operands = 1 : i64, tpu.core_type = #tpu.core_type<tc>, window_params = [{transform_indices = @transform_0, window_bounds = array<i64: 256, 512>}, {transform_indices = @transform_1, window_bounds = array<i64: 512, 128>}, {transform_indices = @transform_2, window_bounds = array<i64: 256, 128>}, {transform_indices = @transform_3, window_bounds = array<i64: 8, 128>}, {transform_indices = @transform_4, window_bounds = array<i64: 8, 128>}]} {
    %c0_i32 = arith.constant 0 : i32
    %0 = arith.cmpi eq, %arg2, %c0_i32 : i32
    %1 = arith.extui %0 : i1 to i32
    %c0_i32_0 = arith.constant 0 : i32
    %2 = arith.cmpi ne, %1, %c0_i32_0 : i32
    scf.if %2 {
      %cst_9 = arith.constant 0.000000e+00 : f32
      %12 = vector.broadcast %cst_9 : f32 to vector<256x128xf32>
      %c0_10 = arith.constant 0 : index
      %c0_11 = arith.constant 0 : index
      %13 = vector.load %arg8[%c0_10, %c0_11] : memref<256x128xf32, #tpu.memory_space<vmem>>, vector<256x128xf32>
      tpu.vector_store %arg8[%c0_10, %c0_11], %12 {strides = array<i32>} : memref<256x128xf32, #tpu.memory_space<vmem>>, vector<256x128xf32>,
    } else {
    }
    %c0 = arith.constant 0 : index
    %c0_1 = arith.constant 0 : index
    %3 = vector.load %arg8[%c0, %c0_1] : memref<256x128xf32, #tpu.memory_space<vmem>>, vector<256x128xf32>
    %c0_2 = arith.constant 0 : index
    %c0_3 = arith.constant 0 : index
    %4 = vector.load %arg3[%c0_2, %c0_3] : memref<256x512xbf16, #tpu.memory_space<vmem>>, vector<256x512xbf16>
    %c0_4 = arith.constant 0 : index
    %c0_5 = arith.constant 0 : index
    %5 = vector.load %arg4[%c0_4, %c0_5] : memref<512x128xbf16, #tpu.memory_space<vmem>>, vector<512x128xbf16>
    %cst = arith.constant dense<0.000000e+00> : vector<256x128xf32>
    %6 = tpu.matmul %4, %5, %cst {dimension_numbers = #tpu.dot_dimension_numbers<[1], [0], [0], [1], [0, 0, 1, 1], [], []>} : vector<256x512xbf16>, vector<512x128xbf16>, vector<256x128xf32> -> vector<256x128xf32>
    %7 = arith.addf %3, %6 : vector<256x128xf32>
    %c0_6 = arith.constant 0 : index
    %c0_7 = arith.constant 0 : index
    %8 = vector.load %arg8[%c0_6, %c0_7] : memref<256x128xf32, #tpu.memory_space<vmem>>, vector<256x128xf32>
    tpu.vector_store %arg8[%c0_6, %c0_7], %7 {strides = array<i32>} : memref<256x128xf32, #tpu.memory_space<vmem>>, vector<256x128xf32>,
    %c2_i32 = arith.constant 2 : i32
    %9 = arith.cmpi eq, %arg2, %c2_i32 : i32
    %10 = arith.extui %9 : i1 to i32
    %c0_i32_8 = arith.constant 0 : i32
    %11 = arith.cmpi ne, %10, %c0_i32_8 : i32
    scf.if %11 {
      %c0_9 = arith.constant 0 : index
      %c0_10 = arith.constant 0 : index
      %12 = vector.load %arg8[%c0_9, %c0_10] : memref<256x128xf32, #tpu.memory_space<vmem>>, vector<256x128xf32>
      %13 = arith.truncf %12 : vector<256x128xf32> to vector<256x128xbf16>
      %c0_11 = arith.constant 0 : index
      %c0_12 = arith.constant 0 : index
      %14 = vector.load %arg5[%c0_11, %c0_12] : memref<256x128xbf16, #tpu.memory_space<vmem>>, vector<256x128xbf16>
      tpu.vector_store %arg5[%c0_11, %c0_12], %13 {strides = array<i32>} : memref<256x128xbf16, #tpu.memory_space<vmem>>, vector<256x128xbf16>,
      %cst_13 = arith.constant dense<0.000000e+00> : vector<128xf32>
      %15 = vector.multi_reduction <add>, %12, %cst_13 [0] : vector<256x128xf32> to vector<128xf32>
      %16 = vector.shape_cast %15 : vector<128xf32> to vector<1x128xf32>
      %17 = arith.mulf %12, %12 : vector<256x128xf32>
      %cst_14 = arith.constant dense<0.000000e+00> : vector<128xf32>
      %18 = vector.multi_reduction <add>, %17, %cst_14 [0] : vector<256x128xf32> to vector<128xf32>
      %19 = vector.shape_cast %18 : vector<128xf32> to vector<1x128xf32>
      %20 = vector.shape_cast %16 : vector<1x128xf32> to vector<1x128xf32>
      %21 = vector.broadcast %20 : vector<1x128xf32> to vector<8x128xf32>
      %c0_15 = arith.constant 0 : index
      %c0_16 = arith.constant 0 : index
      %22 = vector.load %arg6[%c0_15, %c0_16] : memref<8x128xf32, #tpu.memory_space<vmem>>, vector<8x128xf32>
      tpu.vector_store %arg6[%c0_15, %c0_16], %21 {strides = array<i32>} : memref<8x128xf32, #tpu.memory_space<vmem>>, vector<8x128xf32>,
      %23 = vector.shape_cast %19 : vector<1x128xf32> to vector<1x128xf32>
      %24 = vector.broadcast %23 : vector<1x128xf32> to vector<8x128xf32>
      %c0_17 = arith.constant 0 : index
      %c0_18 = arith.constant 0 : index
      %25 = vector.load %arg7[%c0_17, %c0_18] : memref<8x128xf32, #tpu.memory_space<vmem>>, vector<8x128xf32>
      tpu.vector_store %arg7[%c0_17, %c0_18], %24 {strides = array<i32>} : memref<8x128xf32, #tpu.memory_space<vmem>>, vector<8x128xf32>,
    } else {
    }
    return
  }
  func.func @transform_0(%arg0: i32, %arg1: i32, %arg2: i32) -> (i32, i32) {
    %c0_i32 = arith.constant 0 : i32
    return %arg0, %arg2 : i32, i32
  }
  func.func @transform_1(%arg0: i32, %arg1: i32, %arg2: i32) -> (i32, i32) {
    %c0_i32 = arith.constant 0 : i32
    return %arg2, %arg1 : i32, i32
  }
  func.func @transform_2(%arg0: i32, %arg1: i32, %arg2: i32) -> (i32, i32) {
    %c0_i32 = arith.constant 0 : i32
    return %arg0, %arg1 : i32, i32
  }
  func.func @transform_3(%arg0: i32, %arg1: i32, %arg2: i32) -> (i32, i32) {
    %c0_i32 = arith.constant 0 : i32
    return %arg0, %arg1 : i32, i32
  }
  func.func @transform_4(%arg0: i32, %arg1: i32, %arg2: i32) -> (i32, i32) {
    %c0_i32 = arith.constant 0 : i32
    return %arg0, %arg1 : i32, i32
  }
}

</mosaic_0001>

<bundles_post_ra>
// kernel: tpu_custom_call.1
= control target key start
LH: loop header
LB: loop body
LE: loop exit
PB: predicated region body
PF: predicated region fallthrough
CT: control target
= control target key end

     0   :  { %s3509_s0 = inlined_call_operand.hbm [shape: bf16[1024,1536], index: 0, kind: input, shape index: {}]   ;;  %s3510_s1 = inlined_call_operand.hbm [shape: bf16[1536,128], index: 1, kind: input, shape index: {}]   ;;  %s3511_s2 = inlined_call_operand.hbm [shape: bf16[1024,128], index: 2, kind: output, shape index: {0}]   ;;  %s3512_s3 = inlined_call_operand.hbm [shape: f32[32,128], index: 3, kind: output, shape index: {1}]   ;;  %s3513_s4 = inlined_call_operand.hbm [shape: f32[32,128], index: 4, kind: output, shape index: {2}]  }
   0x1   :  { %3528 = sst [smem:[#allocation26_spill]] %s3509_s0 }
   0x2   :  { %3529 = sst [smem:[#allocation27_spill]] %s3510_s1 }
   0x3   :  { %3530 = sst [smem:[#allocation28_spill]] %s3511_s2 }
   0x4   :  { %3531 = sst [smem:[#allocation29_spill]] %s3512_s3 }
   0x5   :  { %3532 = sst [smem:[#allocation30_spill]] %s3513_s4 }
   0x6   :  { %10 = vsyncpa [#allocation4], 0 }
   0x7   :  { %12 = vsyncpa [#allocation4 + $0x1], 0 }
   0x8   :  { %13 = vsyncpa [#allocation7], 0 }
   0x9   :  { %15 = vsyncpa [#allocation7 + $0x1], 0 }
   0xa   :  { %16 = vsyncpa [#allocation5], 0 }
   0xb   :  { %18 = vsyncpa [#allocation5 + $0x1], 0 }
   0xc   :  { %19 = vsyncpa [#allocation10], 0 }
   0xd   :  { %21 = vsyncpa [#allocation10 + $0x1], 0  ;;  %s2951_s15 = smov 0   ;;  %s2953_s16 = smov 0  }
   0xe   :  { %s2955_s17 = smov 0   ;;  %s2957_s18 = smov 0  }
   0xf   :  { %s2959_s19 = smov 0   ;;  %s2961_s20 = smov 0  }
  0x10   :  { %s2963_s21 = smov 0   ;;  %s2965_s22 = smov 0  }
  0x11   :  { %s2967_s23 = smov 0   ;;  %s2969_s24 = smov 0  }
  0x12   :  { %s2971_s25 = smov 0   ;;  %s2973_s26 = smov 0  }
  0x13   :  { %s2975_s27 = smov 0   ;;  %s2977_s28 = smov 0  }
  0x14 LB: > { %3533 = sst [smem:[#allocation16_spill]] %s2884_s20  ;;  %s39_s29 = sadd.s32 1, %s2908_s26  ;;  %s2916_s28 = sphi %s2977_s28, %s27_s28   ;;  %s2912_s27 = sphi %s2975_s27, %s3568_s27   ;;  %s2908_s26 = sphi %s2973_s26, %s3567_s26   ;;  %s2904_s25 = sphi %s2971_s25, %s3566_s25   ;;  %s2900_s24 = sphi %s2969_s24, %s3565_s24   ;;  %s2896_s23 = sphi %s2967_s23, %s3564_s23   ;;  %s2892_s22 = sphi %s2965_s22, %s3563_s22   ;;  %s2888_s21 = sphi %s2963_s21, %s3562_s21   ;;  %s2884_s20 = sphi %s2961_s20, %s3561_s20   ;;  %s2880_s19 = sphi %s2959_s19, %s3574_s19   ;;  %s2876_s18 = sphi %s2957_s18, %s3573_s18   ;;  %s2872_s17 = sphi %s2955_s17, %s3572_s17   ;;  %s2868_s16 = sphi %s2953_s16, %s3571_s16   ;;  %s2864_s15 = sphi %s2951_s15, %s3570_s15  }
  0x15   : > { %3534 = sst [smem:[#allocation17_spill]] %s2892_s22  ;;  %s46_s30 = sadd.s32 1, %s2912_s27 }
  0x16   : > { %3535 = sst [smem:[#allocation18_spill]] %s2896_s23  ;;  %p40_p0 = scmp.ge.s32.totalorder %s39_s29, 3 }
  0x17   : > { %3536 = sst [smem:[#allocation19_spill]] %s2904_s25  ;;  %s55_s5 = sadd.s32 1, %s2896_s23 }
  0x18   : > { %3537 = sst [smem:[#allocation20_spill]] %s2908_s26  ;;  %p62_p1 = scmp.ne.s32.totalorder %s2896_s23, %s2892_s22 }
  0x19   : > { %3538 = sst [smem:[#allocation21_spill]] %s2912_s27  ;;  %p63_p2 = scmp.eq.s32.totalorder %s2916_s28, 0 }
  0x1a   : > { %s3576_s29 = smov (%p40_p0, %s39_s29), 0  ;;  %s3578_s30 = smov (!%p40_p0, %s46_s30), %s2912_s27 }
  0x1b   : > { %3539 = sst [smem:[#allocation22_spill]] %s3576_s29  ;;  %s3032_s6 = ssub.s32 %s2908_s26, %s3576_s29 }
  0x1c   : > { %p3036_p3 = por %p63_p2, %p62_p1  ;;  %p48_p4 = scmp.ge.s32.totalorder %s3578_s30, 4 }
  0x1d   : > { %p68_p5 = scmp.ne.s32.totalorder %s2892_s22, %s2888_s21  ;;  %s111_s8 = sadd.s32 1, %s2872_s17 }
  0x1e   : > { %s3580_s30 = smov (%p48_p4, %s3578_s30), 0  ;;  %p3520_p6 = scmp.lt.s32.totalorder %s2916_s28, 12 }
  0x1f   : > { %3541 = sst [smem:[#allocation23_spill]] %s3580_s30  ;;  %s204_s9 = sand.u32 1, %s2896_s23  }
  0x20   : > { %s50_s10 = ssub.s32 %s2912_s27, %s3580_s30  ;;  %s1894_s12 = sshll.u32 %s204_s9, 9 }
  0x21   : > { %s52_s11 = sor.u32 %s3032_s6, %s50_s10  ;;  %p109_p7 = scmp.eq.s32.totalorder %s50_s10, 0 }
  0x22   : > { %p53_p8 = scmp.eq.s32.totalorder %s52_s11, 0  ;;  %s1896_s29 = sshll.u32 %s2908_s26, 2 }
  0x23   : > { %s3051_s13 = scalar_select %p109_p7, %s2872_s17, %s111_s8  }
  0x24   : > { %s3054_s14 = scalar_select %p53_p8, %s2896_s23, %s55_s5  }
  0x25   : > { %s2496_s4 = smul.u32 384, %s2912_s27  ;;  %s208_s2 = scalar_lea.vmem [#allocation3], %s1894_s12 }
  0x26   : > { %3542 = sst [smem:[#allocation24_spill]] %s3054_s14  ;;  %s219_s3 = sshll.u32 %s208_s2, 4  ;;  %s220_s3 = int_to_ptr.vmem [resolvable:$true] %s219_s3 }
  0x27   : > { %p2508_p9 = pnand %p3520_p6, %p3036_p3  ;;  %s214_s30 = sadd.s32 %s2496_s4, %s1896_s29 }
  0x28   : > { %s1898_s10 = sshll.u32 %s214_s30, 2  ;;  %s3543_s0 = sld [smem:[#allocation26_spill]] }
  0x29   : > { %p1902_p10 = scmp.ge.s32.totalorder %s2916_s28, 1  ;;  %s205_s2 = scalar_lea.sflag [#allocation4], %s204_s9 }
  0x2a   : > { %s2918_s4 = smov 768   ;;  %s2919_s29 = smov 256  }
  0x2b   : > { %s2920_s30 = smov 16   ;;  %p250_p11 = scmp.lt.s32.totalorder %s2916_s28, 13 }
  0x2c   : > { %s3072_s7 = sadd.s32 4294967295, %s2916_s28   ;;  %s3522_s9 = sadd.s32 4294967294, %s2916_s28  }
  0x2d   : > { %p3067_p12 = pnand %p1902_p10, %p250_p11  ;;  %p69_p13 = scmp.eq.s32.totalorder %s3072_s7, 0 }
  0x2e   : > { %s216_s5 = scalar_lea.hbm %s3543_s0, %s1898_s10  ;;  %p81_p0 = scmp.eq.s32.totalorder %s3032_s6, 0 }
  0x2f   : > { %s217_s8 = sshll.u32 %s216_s5, 4  ;;  %s83_s12 = sadd.s32 1, %s2884_s20  ;;  %s218_s8 = int_to_ptr.hbm [resolvable:$true] %s217_s8 }
  0x30   : > { %2510 = dma.hbm_to_vmem [thread:$0]  (!%p2508_p9), %s218_s8, 8192, %s220_s3, %s205_s2, %s2918_s4, %s2919_s29, %s2920_s30  }
  0x31   : > { %p90_p1 = scmp.ne.s32.totalorder %s2884_s20, %s2880_s19  ;;  %p3083_p3 = por %p69_p13, %p68_p5 }
  0x32   : > { %p96_p4 = scmp.ne.s32.totalorder %s2880_s19, %s2876_s18  ;;  %p121_p9 = scmp.ne.s32.totalorder %s2872_s17, %s2868_s16 }
  0x33   : > { %s3090_s10 = scalar_select %p81_p0, %s2884_s20, %s83_s12  }
  0x34   : > { %p3094_p7 = por %p90_p1, %p63_p2  ;;  %p3098_p8 = por %p96_p4, %p69_p13 }
  0x35   : > { %3546 = sst [smem:[#allocation25_spill]] %s3090_s10  ;;  %p122_p10 = scmp.eq.s32.totalorder %s3072_s7, 11 }
  0x36   : > { %p127_p5 = scmp.ne.s32.totalorder %s2868_s16, %s2864_s15  ;;  %p128_p11 = scmp.eq.s32.totalorder %s3522_s9, 11 }
  0x37   : > { %p3109_p6 = por %p122_p10, %p121_p9  ;;  %s229_s21 = sand.u32 1, %s2884_s20  }
  0x38   : > { %p3114_p2 = por %p128_p11, %p127_p5  ;;  %s1899_s8 = sshll.u32 %s229_s21, 8 }
  0x39   : > { %s2303_s2 = sshll.u32 %s2908_s26, 8  ;;  %s3551_s1 = sld [smem:[#allocation27_spill]] }
  0x3a   : > { %s233_s0 = scalar_lea.vmem [#allocation6], %s1899_s8  ;;  %p3552_p13 = scmp.lt.s32.totalorder %s2916_s28, 12 }
  0x3b   : > { %s242_s27 = sshll.u32 %s233_s0, 4  ;;  %s230_s9 = scalar_lea.sflag [#allocation7], %s229_s21  ;;  %s243_s27 = int_to_ptr.vmem [resolvable:$true] %s242_s27 }
  0x3c   : > { %p2511_p0 = pnand %p3552_p13, %p3094_p7  ;;  %s2921_s14 = smov 64  }
  0x3d   : > { %s2922_s23 = smov 4   ;;  %254 = sbr.rel (%p3067_p12) target bundleno = 667 (0x29b), region = 28 }
  0x3e   : > { %s256_s26 = sand.u32 (!%p3067_p12), 1, %s2892_s22  }
  0x3f   : > { %s239_s30 = scalar_lea.hbm %s3551_s1, %s2303_s2  ;;  %s1903_s4 = sshll.u32 (!%p3067_p12), %s256_s26, 9 }
  0x40   : > { %s240_s12 = sshll.u32 %s239_s30, 4  ;;  %s257_s2 = scalar_lea.sflag (!%p3067_p12), [#allocation4], %s256_s26  ;;  %s241_s12 = int_to_ptr.hbm [resolvable:$true] %s240_s12 }
  0x41   : > { %2513 = dma.hbm_to_vmem [thread:$0]  (!%p2511_p0), %s241_s12, 4096, %s243_s27, %s230_s9, %s2921_s14, %s2921_s14, %s2922_s23  }
  0x42   : > { %s3129_s29 = scalar_lea.vmem [#allocation3], %s1903_s4 }
  0x43   : > { %2847 = dma.done.wait (%p3083_p3), %s257_s2, 8192  }
  0x44   : > { %2849 = vsyncadd (%p3083_p3), %s257_s2, 4294959104  ;;  %s266_s0 = sand.u32 1, %s2880_s19  }
  0x45   : > { %s1904_s11 = sshll.u32 %s266_s0, 8  ;;  %s267_s23 = scalar_lea.sflag [#allocation7], %s266_s0 }
  0x46   : > { %s3136_s27 = scalar_lea.vmem [#allocation6], %s1904_s11 }
  0x47   : > { %2851 = dma.done.wait (%p3098_p8), %s267_s23, 4096  }
  0x48   : > { %2853 = vsyncadd (%p3098_p8), %s267_s23, 4294963200  ;;  %s3143_s26 = sand.u32 1, %s2868_s16   ;;  %p1908_p12 = scmp.ne.s32.totalorder %s2900_s24, 0 }
  0x49   : > { %s1905_s14 = sshll.u32 %s3143_s26, 7  ;;  %s1906_s25 = sshll.u32 %s3143_s26, 3 }
  0x4a   : > { %s3147_s9 = scalar_lea.vmem [#allocation8], %s1905_s14  ;;  %s3149_s3 = scalar_lea.vmem [#allocation9], %s1906_s25 }
  0x4b   : > { %s3151_s21 = scalar_lea.vmem [#allocation11], %s1906_s25  ;;  %318 = sbr.rel (%p1908_p12) target bundleno = 113 (0x71), region = 40 }
  0x50   : > { %v2923_v0 = vmov 0.0  }
  0x51   : > { %319 = vst [vmem:[#allocation2 + $0xb0] sm:$0xff] %v2923_v0 }
  0x52   : > { %320 = vst [vmem:[#allocation2] sm:$0xff] %v2923_v0 }
  0x53   : > { %321 = vst [vmem:[#allocation2 + $0xd8] sm:$0xff] %v2923_v0 }
  0x54   : > { %322 = vst [vmem:[#allocation2 + $0x18] sm:$0xff] %v2923_v0 }
  0x55   : > { %323 = vst [vmem:[#allocation2 + $0x50] sm:$0xff] %v2923_v0 }
  0x56   : > { %324 = vst [vmem:[#allocation2 + $0x68] sm:$0xff] %v2923_v0 }
  0x57   : > { %325 = vst [vmem:[#allocation2 + $0x30] sm:$0xff] %v2923_v0 }
  0x58   : > { %326 = vst [vmem:[#allocation2 + $0x48] sm:$0xff] %v2923_v0 }
  0x59   : > { %327 = vst [vmem:[#allocation2 + $0x80] sm:$0xff] %v2923_v0 }
  0x5a   : > { %328 = vst [vmem:[#allocation2 + $0x88] sm:$0xff] %v2923_v0 }
  0x5b   : > { %329 = vst [vmem:[#allocation2 + $0xe8] sm:$0xff] %v2923_v0 }
  0x5c   : > { %330 = vst [vmem:[#allocation2 + $0xb8] sm:$0xff] %v2923_v0 }
  0x5d   : > { %331 = vst [vmem:[#allocation2 + $0x60] sm:$0xff] %v2923_v0 }
  0x5e   : > { %332 = vst [vmem:[#allocation2 + $0xf0] sm:$0xff] %v2923_v0 }
  0x5f   : > { %333 = vst [vmem:[#allocation2 + $0x8] sm:$0xff] %v2923_v0 }
  0x60   : > { %334 = vst [vmem:[#allocation2 + $0x78] sm:$0xff] %v2923_v0 }
  0x61   : > { %335 = vst [vmem:[#allocation2 + $0x38] sm:$0xff] %v2923_v0 }
  0x62   : > { %336 = vst [vmem:[#allocation2 + $0x58] sm:$0xff] %v2923_v0 }
  0x63   : > { %337 = vst [vmem:[#allocation2 + $0x40] sm:$0xff] %v2923_v0 }
  0x64   : > { %338 = vst [vmem:[#allocation2 + $0xc8] sm:$0xff] %v2923_v0 }
  0x65   : > { %339 = vst [vmem:[#allocation2 + $0xe0] sm:$0xff] %v2923_v0 }
  0x66   : > { %340 = vst [vmem:[#allocation2 + $0x90] sm:$0xff] %v2923_v0 }
  0x67   : > { %341 = vst [vmem:[#allocation2 + $0x70] sm:$0xff] %v2923_v0 }
  0x68   : > { %342 = vst [vmem:[#allocation2 + $0xc0] sm:$0xff] %v2923_v0 }
  0x69   : > { %343 = vst [vmem:[#allocation2 + $0xa8] sm:$0xff] %v2923_v0 }
  0x6a   : > { %344 = vst [vmem:[#allocation2 + $0xd0] sm:$0xff] %v2923_v0 }
  0x6b   : > { %345 = vst [vmem:[#allocation2 + $0x10] sm:$0xff] %v2923_v0 }
  0x6c   : > { %346 = vst [vmem:[#allocation2 + $0x28] sm:$0xff] %v2923_v0 }
  0x6d   : > { %347 = vst [vmem:[#allocation2 + $0xa0] sm:$0xff] %v2923_v0 }
  0x6e   : > { %348 = vst [vmem:[#allocation2 + $0xf8] sm:$0xff] %v2923_v0 }
  0x6f   : > { %349 = vst [vmem:[#allocation2 + $0x20] sm:$0xff] %v2923_v0 }
  0x70   : > { %350 = vst [vmem:[#allocation2 + $0x98] sm:$0xff] %v2923_v0 }
  0x71 PF: > { %v2375_v1 = vld [vmem:[%s3136_s27 + $0x38] sm:$0xff]  ;;  %v2374_v5 = vld [vmem:[%s3136_s27 + $0x30] sm:$0xff]  ;;  %v2373_v9 = vld [vmem:[%s3136_s27 + $0x28] sm:$0xff]  ;;  %p2293_p1 = scmp.ne.s32.totalorder %s2900_s24, 2 }
  0x72   : > { %v2383_v2 = vld [vmem:[%s3136_s27 + $0x78] sm:$0xff]  ;;  %1023 = vmatpush.bf16.msra.mxu0 %v2375_v1  ;;  %v2382_v6 = vld [vmem:[%s3136_s27 + $0x70] sm:$0xff]  ;;  %v2381_v10 = vld [vmem:[%s3136_s27 + $0x68] sm:$0xff] }
  0x73   : > { %v2391_v3 = vld [vmem:[%s3136_s27 + $0xb8] sm:$0xff]  ;;  %1112 = vmatpush.bf16.msra.mxu1 %v2383_v2  ;;  %v2390_v7 = vld [vmem:[%s3136_s27 + $0xb0] sm:$0xff]  ;;  %v2389_v11 = vld [vmem:[%s3136_s27 + $0xa8] sm:$0xff] }
  0x74   : > { %v2399_v4 = vld [vmem:[%s3136_s27 + $0xf8] sm:$0xff]  ;;  %1201 = vmatpush.bf16.msra.mxu2 %v2391_v3  ;;  %v2398_v8 = vld [vmem:[%s3136_s27 + $0xf0] sm:$0xff]  ;;  %v2397_v12 = vld [vmem:[%s3136_s27 + $0xe8] sm:$0xff] }
  0x75   : > { %1290 = vmatpush.bf16.msra.mxu3 %v2399_v4  ;;  %v2372_v13 = vld [vmem:[%s3136_s27 + $0x20] sm:$0xff]  ;;  %v2371_v17 = vld [vmem:[%s3136_s27 + $0x18] sm:$0xff]  ;;  %v2370_v21 = vld [vmem:[%s3136_s27 + $0x10] sm:$0xff] }
  0x76   : > { %1024 = vmatpush.bf16.msra.mxu0 %v2374_v5  ;;  %v2380_v14 = vld [vmem:[%s3136_s27 + $0x60] sm:$0xff]  ;;  %v2379_v18 = vld [vmem:[%s3136_s27 + $0x58] sm:$0xff]  ;;  %v2378_v22 = vld [vmem:[%s3136_s27 + $0x50] sm:$0xff] }
  0x77   : > { %1113 = vmatpush.bf16.msra.mxu1 %v2382_v6  ;;  %v2388_v15 = vld [vmem:[%s3136_s27 + $0xa0] sm:$0xff]  ;;  %v2387_v19 = vld [vmem:[%s3136_s27 + $0x98] sm:$0xff]  ;;  %v2386_v23 = vld [vmem:[%s3136_s27 + $0x90] sm:$0xff] }
  0x78   : > { %1202 = vmatpush.bf16.msra.mxu2 %v2390_v7  ;;  %v2396_v16 = vld [vmem:[%s3136_s27 + $0xe0] sm:$0xff]  ;;  %v2395_v20 = vld [vmem:[%s3136_s27 + $0xd8] sm:$0xff]  ;;  %v2394_v24 = vld [vmem:[%s3136_s27 + $0xd0] sm:$0xff] }
  0x79   : > { %1291 = vmatpush.bf16.msra.mxu3 %v2398_v8  ;;  %v2369_v25 = vld [vmem:[%s3136_s27 + $0x8] sm:$0xff]  ;;  %v2368_v29 = vld [vmem:[%s3136_s27] sm:$0xff]  ;;  %v2306_v34 = vld [vmem:[%s3129_s29 + $0xc] sm:$0xf0] }
  0x7a   : > { %1025 = vmatpush.bf16.msra.mxu0 %v2373_v9  ;;  %v2377_v26 = vld [vmem:[%s3136_s27 + $0x48] sm:$0xff]  ;;  %v2376_v30 = vld [vmem:[%s3136_s27 + $0x40] sm:$0xff]  ;;  %v1913_v36 = vld [vmem:[%s3129_s29 + $0x10] sm:$0xf0] }
  0x7b   : > { %1114 = vmatpush.bf16.msra.mxu1 %v2381_v10  ;;  %v2385_v27 = vld [vmem:[%s3136_s27 + $0x88] sm:$0xff]  ;;  %v2384_v31 = vld [vmem:[%s3136_s27 + $0x80] sm:$0xff]  ;;  %v2307_v38 = vld [vmem:[%s3129_s29 + $0x14] sm:$0xf0] }
  0x7c   : > { %1203 = vmatpush.bf16.msra.mxu2 %v2389_v11  ;;  %v2393_v28 = vld [vmem:[%s3136_s27 + $0xc8] sm:$0xff]  ;;  %v2392_v32 = vld [vmem:[%s3136_s27 + $0xc0] sm:$0xff]  ;;  %v1921_v40 = vld [vmem:[%s3129_s29 + $0x18] sm:$0xf0] }
  0x7d   : > { %1292 = vmatpush.bf16.msra.mxu3 %v2397_v12  ;;  %v1911_v33 = vld [vmem:[%s3129_s29] sm:$0xf]  ;;  %v2304_v35 = vld [vmem:[%s3129_s29 + $0x4] sm:$0xf]  ;;  %v1919_v37 = vld [vmem:[%s3129_s29 + $0x8] sm:$0xf] }
  0x7e   : > { %1026 = vmatpush.bf16.msra.mxu0 %v2372_v13  ;;  %v2305_v39 = vld [vmem:[%s3129_s29 + $0xc] sm:$0xf]  ;;  %v1912_v41 = vor.u32 %v2306_v34, %v1911_v33  ;;  %v1916_v42 = vor.u32 %v2304_v35, %v1913_v36  ;;  %v1920_v43 = vor.u32 %v2307_v38, %v1919_v37  ;;  %v1927_v45 = vld [vmem:[%s3129_s29 + $0x20] sm:$0xf]  ;;  %v2310_v46 = vld [vmem:[%s3129_s29 + $0x2c] sm:$0xf0] }
  0x7f   : > { %1115 = vmatpush.bf16.msra.mxu1 %v2380_v14  ;;  %v1924_v44 = vor.u32 %v2305_v39, %v1921_v40  ;;  %v2308_v47 = vld [vmem:[%s3129_s29 + $0x24] sm:$0xf]  ;;  %v1929_v48 = vld [vmem:[%s3129_s29 + $0x30] sm:$0xf0]  ;;  %v1935_v49 = vld [vmem:[%s3129_s29 + $0x28] sm:$0xf]  ;;  %v1928_v53 = vor.u32 %v2310_v46, %v1927_v45 }
  0x80   : > { %1204 = vmatpush.bf16.msra.mxu2 %v2388_v15  ;;  %v2311_v50 = vld [vmem:[%s3129_s29 + $0x34] sm:$0xf0]  ;;  %v2309_v51 = vld [vmem:[%s3129_s29 + $0x2c] sm:$0xf]  ;;  %v1937_v52 = vld [vmem:[%s3129_s29 + $0x38] sm:$0xf0]  ;;  %v1932_v54 = vor.u32 %v2308_v47, %v1929_v48 }
  0x81   : > { %1293 = vmatpush.bf16.msra.mxu3 %v2396_v16  ;;  %v1936_v55 = vor.u32 %v2311_v50, %v1935_v49  ;;  %v1940_v56 = vor.u32 %v2309_v51, %v1937_v52  ;;  %v1943_v57 = vld [vmem:[%s3129_s29 + $0x40] sm:$0xf]  ;;  %v2314_v58 = vld [vmem:[%s3129_s29 + $0x4c] sm:$0xf0]  ;;  %v2312_v59 = vld [vmem:[%s3129_s29 + $0x44] sm:$0xf] }
  0x82   : > { %1027 = vmatpush.bf16.msra.mxu0 %v2371_v17  ;;  %v1945_v60 = vld [vmem:[%s3129_s29 + $0x50] sm:$0xf0]  ;;  %v1951_v61 = vld [vmem:[%s3129_s29 + $0x48] sm:$0xf]  ;;  %v2315_v62 = vld [vmem:[%s3129_s29 + $0x54] sm:$0xf0]  ;;  %v1944_v1 = vor.u32 %v2314_v58, %v1943_v57 }
  0x83   : > { %1116 = vmatpush.bf16.msra.mxu1 %v2379_v18  ;;  %v2313_v63 = vld [vmem:[%s3129_s29 + $0x4c] sm:$0xf]  ;;  %v1953_v0 = vld [vmem:[%s3129_s29 + $0x58] sm:$0xf0]  ;;  %v1948_v2 = vor.u32 %v2312_v59, %v1945_v60  ;;  %v1952_v3 = vor.u32 %v2315_v62, %v1951_v61  ;;  %v1959_v5 = vld [vmem:[%s3129_s29 + $0x60] sm:$0xf] }
  0x84   : > { %1205 = vmatpush.bf16.msra.mxu2 %v2387_v19  ;;  %v1956_v4 = vor.u32 %v2313_v63, %v1953_v0  ;;  %v2318_v6 = vld [vmem:[%s3129_s29 + $0x6c] sm:$0xf0]  ;;  %v2316_v7 = vld [vmem:[%s3129_s29 + $0x64] sm:$0xf]  ;;  %v1961_v8 = vld [vmem:[%s3129_s29 + $0x70] sm:$0xf0] }
  0x85   : > { %1294 = vmatpush.bf16.msra.mxu3 %v2395_v20  ;;  %v1967_v9 = vld [vmem:[%s3129_s29 + $0x68] sm:$0xf]  ;;  %v2319_v10 = vld [vmem:[%s3129_s29 + $0x74] sm:$0xf0]  ;;  %v2317_v11 = vld [vmem:[%s3129_s29 + $0x6c] sm:$0xf]  ;;  %v1960_v13 = vor.u32 %v2318_v6, %v1959_v5  ;;  %v1964_v14 = vor.u32 %v2316_v7, %v1961_v8 }
  0x86   : > { %1028 = vmatpush.bf16.msra.mxu0 %v2370_v21  ;;  %v1969_v12 = vld [vmem:[%s3129_s29 + $0x78] sm:$0xf0]  ;;  %v1968_v15 = vor.u32 %v2319_v10, %v1967_v9  ;;  %v1975_v17 = vld [vmem:[%s3129_s29 + $0x80] sm:$0xf]  ;;  %v2322_v18 = vld [vmem:[%s3129_s29 + $0x8c] sm:$0xf0] }
  0x87   : > { %1117 = vmatpush.bf16.msra.mxu1 %v2378_v22  ;;  %v1972_v16 = vor.u32 %v2317_v11, %v1969_v12  ;;  %v2320_v19 = vld [vmem:[%s3129_s29 + $0x84] sm:$0xf]  ;;  %v1977_v20 = vld [vmem:[%s3129_s29 + $0x90] sm:$0xf0]  ;;  %v1983_v21 = vld [vmem:[%s3129_s29 + $0x88] sm:$0xf] }
  0x88   : > { %1206 = vmatpush.bf16.msra.mxu2 %v2386_v23  ;;  %v2323_v22 = vld [vmem:[%s3129_s29 + $0x94] sm:$0xf0]  ;;  %v2321_v23 = vld [vmem:[%s3129_s29 + $0x8c] sm:$0xf]  ;;  %v1999_v33 = vld [vmem:[%s3129_s29 + $0xa8] sm:$0xf] }
  0x89   : > { %1295 = vmatpush.bf16.msra.mxu3 %v2394_v24  ;;  %v1985_v24 = vld [vmem:[%s3129_s29 + $0x98] sm:$0xf0]  ;;  %v2327_v34 = vld [vmem:[%s3129_s29 + $0xb4] sm:$0xf0]  ;;  %v2325_v35 = vld [vmem:[%s3129_s29 + $0xac] sm:$0xf] }
  0x8a   : > { %1029 = vmatpush.bf16.msra.mxu0 %v2369_v25  ;;  %v1976_v25 = vor.u32 %v2322_v18, %v1975_v17  ;;  %v2001_v36 = vld [vmem:[%s3129_s29 + $0xb8] sm:$0xf0]  ;;  %v2000_v39 = vor.u32 %v2327_v34, %v1999_v33  ;;  %v2015_v45 = vld [vmem:[%s3129_s29 + $0xc8] sm:$0xf]  ;;  %v2331_v46 = vld [vmem:[%s3129_s29 + $0xd4] sm:$0xf0] }
  0x8b   : > { %1118 = vmatpush.bf16.msra.mxu1 %v2377_v26  ;;  %v1980_v26 = vor.u32 %v2320_v19, %v1977_v20  ;;  %v2004_v40 = vor.u32 %v2325_v35, %v2001_v36  ;;  %v2329_v47 = vld [vmem:[%s3129_s29 + $0xcc] sm:$0xf]  ;;  %v2017_v48 = vld [vmem:[%s3129_s29 + $0xd8] sm:$0xf0]  ;;  %v2016_v51 = vor.u32 %v2331_v46, %v2015_v45  ;;  %v2031_v57 = vld [vmem:[%s3129_s29 + $0xe8] sm:$0xf] }
  0x8c   : > { %1207 = vmatpush.bf16.msra.mxu2 %v2385_v27  ;;  %v1984_v27 = vor.u32 %v2323_v22, %v1983_v21  ;;  %v2020_v52 = vor.u32 %v2329_v47, %v2017_v48  ;;  %v2335_v58 = vld [vmem:[%s3129_s29 + $0xf4] sm:$0xf0]  ;;  %v2333_v59 = vld [vmem:[%s3129_s29 + $0xec] sm:$0xf]  ;;  %v2033_v60 = vld [vmem:[%s3129_s29 + $0xf8] sm:$0xf0] }
  0x8d   : > { %1296 = vmatpush.bf16.msra.mxu3 %v2393_v28  ;;  %v1988_v28 = vor.u32 %v2321_v23, %v1985_v24  ;;  %v2032_v63 = vor.u32 %v2335_v58, %v2031_v57  ;;  %v2036_v0 = vor.u32 %v2333_v59, %v2033_v60  ;;  %v2047_v5 = vld [vmem:[%s3129_s29 + $0x108] sm:$0xf]  ;;  %v2339_v6 = vld [vmem:[%s3129_s29 + $0x114] sm:$0xf0]  ;;  %v2337_v7 = vld [vmem:[%s3129_s29 + $0x10c] sm:$0xf] }
  0x8e   : > { %1030 = vmatpush.bf16.msra.mxu0 %v2368_v29  ;;  %v1991_v29 = vld [vmem:[%s3129_s29 + $0xa0] sm:$0xf]  ;;  %v2049_v8 = vld [vmem:[%s3129_s29 + $0x118] sm:$0xf0]  ;;  %v351_v21 = vld [vmem:[#allocation2 + $0xb0] sm:$0xff] }
  0x8f   : > { %1119 = vmatpush.bf16.msra.mxu1 %v2376_v30  ;;  %v2326_v30 = vld [vmem:[%s3129_s29 + $0xac] sm:$0xf0]  ;;  %v2055_v23 = vld [vmem:[%s3129_s29 + $0x120] sm:$0xf]  ;;  %v2073_v57 = vld [vmem:[%s3129_s29 + $0x150] sm:$0xf0] }
  0x90   : > { %1208 = vmatpush.bf16.msra.mxu2 %v2384_v31  ;;  %v2324_v31 = vld [vmem:[%s3129_s29 + $0xa4] sm:$0xf]  ;;  %v1992_v37 = vor.u32 %v2326_v30, %v1991_v29  ;;  %v2342_v24 = vld [vmem:[%s3129_s29 + $0x12c] sm:$0xf0]  ;;  %v2343_v29 = vld [vmem:[%s3129_s29 + $0x134] sm:$0xf0] }
  0x91   : > { %1297 = vmatpush.bf16.msra.mxu3 %v2392_v32  ;;  %1031 = vmatmul.bf16.vlgmr.msra.gmra.mxu0 %v1912_v41  ;;  %v1993_v32 = vld [vmem:[%s3129_s29 + $0xb0] sm:$0xf0]  ;;  %v2007_v41 = vld [vmem:[%s3129_s29 + $0xc0] sm:$0xf]  ;;  %v2341_v30 = vld [vmem:[%s3129_s29 + $0x12c] sm:$0xf]  ;;  %v2056_v35 = vor.u32 %v2342_v24, %v2055_v23 }
  0x92   : > { %1120 = vmatmul.bf16.vlgmr.msra.gmra.mxu1 %v1916_v42  ;;  %v1996_v38 = vor.u32 %v2324_v31, %v1993_v32  ;;  %v2330_v42 = vld [vmem:[%s3129_s29 + $0xcc] sm:$0xf0]  ;;  %v2065_v31 = vld [vmem:[%s3129_s29 + $0x138] sm:$0xf0]  ;;  %v2079_v58 = vld [vmem:[%s3129_s29 + $0x148] sm:$0xf] }
  0x93   : > { %1209 = vmatmul.bf16.vlgmr.msra.gmra.mxu2 %v1920_v43  ;;  %v2328_v43 = vld [vmem:[%s3129_s29 + $0xc4] sm:$0xf]  ;;  %v2008_v49 = vor.u32 %v2330_v42, %v2007_v41  ;;  %v2068_v41 = vor.u32 %v2341_v30, %v2065_v31  ;;  %v2347_v59 = vld [vmem:[%s3129_s29 + $0x154] sm:$0xf0]  ;;  %v2345_v60 = vld [vmem:[%s3129_s29 + $0x14c] sm:$0xf] }
  0x94   : > { %1298 = vmatmul.bf16.vlgmr.msra.gmra.mxu3 %v1924_v44  ;;  %v2009_v44 = vld [vmem:[%s3129_s29 + $0xd0] sm:$0xf0]  ;;  %v352_v42 = vld [vmem:[#allocation2] sm:$0xff]  ;;  %v2095_v24 = vld [vmem:[%s3129_s29 + $0x168] sm:$0xf] }
  0x95   : > { %v2012_v50 = vor.u32 %v2328_v43, %v2009_v44  ;;  %v2089_v23 = vld [vmem:[%s3129_s29 + $0x170] sm:$0xf0] }
  0xa1   : > { %1036 = vmatmul.bf16.gmra.mxu0 %v1928_v53  ;;  %v2023_v53 = vld [vmem:[%s3129_s29 + $0xe0] sm:$0xf] }
  0xa2   : > { %1125 = vmatmul.bf16.gmra.mxu1 %v1932_v54  ;;  %v2334_v54 = vld [vmem:[%s3129_s29 + $0xec] sm:$0xf0] }
  0xa3   : > { %1214 = vmatmul.bf16.gmra.mxu2 %v1936_v55  ;;  %v2332_v55 = vld [vmem:[%s3129_s29 + $0xe4] sm:$0xf]  ;;  %v2024_v61 = vor.u32 %v2334_v54, %v2023_v53  ;;  %v2071_v53 = vld [vmem:[%s3129_s29 + $0x140] sm:$0xf]  ;;  %v2346_v54 = vld [vmem:[%s3129_s29 + $0x14c] sm:$0xf0] }
  0xa4   : > { %1303 = vmatmul.bf16.gmra.mxu3 %v1940_v56  ;;  %v2025_v56 = vld [vmem:[%s3129_s29 + $0xf0] sm:$0xf0] }
  0xa5   : > { %v2028_v62 = vor.u32 %v2332_v55, %v2025_v56  ;;  %v2344_v56 = vld [vmem:[%s3129_s29 + $0x144] sm:$0xf] }
  0xb1   : > { %1041 = vmatmul.bf16.gmra.mxu0 %v1944_v1  ;;  %v2039_v1 = vld [vmem:[%s3129_s29 + $0x100] sm:$0xf] }
  0xb2   : > { %1130 = vmatmul.bf16.gmra.mxu1 %v1948_v2  ;;  %v2338_v2 = vld [vmem:[%s3129_s29 + $0x10c] sm:$0xf0] }
  0xb3   : > { %1219 = vmatmul.bf16.gmra.mxu2 %v1952_v3  ;;  %v2336_v3 = vld [vmem:[%s3129_s29 + $0x104] sm:$0xf]  ;;  %v2040_v9 = vor.u32 %v2338_v2, %v2039_v1  ;;  %v2072_v1 = vor.u32 %v2346_v54, %v2071_v53  ;;  %v2076_v2 = vor.u32 %v2344_v56, %v2073_v57  ;;  %v2105_v53 = vld [vmem:[%s3129_s29 + $0x190] sm:$0xf0]  ;;  %v2111_v54 = vld [vmem:[%s3129_s29 + $0x188] sm:$0xf] }
  0xb4   : > { %1308 = vmatmul.bf16.gmra.mxu3 %v1956_v4  ;;  %v2041_v4 = vld [vmem:[%s3129_s29 + $0x110] sm:$0xf0]  ;;  %v2353_v56 = vld [vmem:[%s3129_s29 + $0x18c] sm:$0xf]  ;;  %v2113_v57 = vld [vmem:[%s3129_s29 + $0x198] sm:$0xf0] }
  0xb5   : > { %v2044_v10 = vor.u32 %v2336_v3, %v2041_v4 }
  0xc1   : > { %1046 = vmatmul.bf16.gmra.mxu0 %v1960_v13  ;;  %v2048_v13 = vor.u32 %v2339_v6, %v2047_v5  ;;  %v2080_v6 = vor.u32 %v2347_v59, %v2079_v58 }
  0xc2   : > { %1135 = vmatmul.bf16.gmra.mxu1 %v1964_v14  ;;  %v2052_v14 = vor.u32 %v2337_v7, %v2049_v8  ;;  %v354_v8 = vld [vmem:[#allocation2 + $0x18] sm:$0xff] }
  0xc3   : > { %1224 = vmatmul.bf16.gmra.mxu2 %v1968_v15 }
  0xc4   : > { %1313 = vmatmul.bf16.gmra.mxu3 %v1972_v16 }
  0xd1   : > { %1051 = vmatmul.bf16.gmra.mxu0 %v1976_v25 }
  0xd2   : > { %1140 = vmatmul.bf16.gmra.mxu1 %v1980_v26  ;;  %v2340_v26 = vld [vmem:[%s3129_s29 + $0x124] sm:$0xf] }
  0xd3   : > { %1229 = vmatmul.bf16.gmra.mxu2 %v1984_v27  ;;  %v2057_v27 = vld [vmem:[%s3129_s29 + $0x130] sm:$0xf0] }
  0xd4   : > { %1318 = vmatmul.bf16.gmra.mxu3 %v1988_v28  ;;  %v2063_v28 = vld [vmem:[%s3129_s29 + $0x128] sm:$0xf]  ;;  %v2060_v36 = vor.u32 %v2340_v26, %v2057_v27  ;;  %v2349_v26 = vld [vmem:[%s3129_s29 + $0x16c] sm:$0xf]  ;;  %v2097_v27 = vld [vmem:[%s3129_s29 + $0x178] sm:$0xf0] }
  0xe1   : > { %1056 = vmatmul.bf16.gmra.mxu0 %v1992_v37 }
  0xe2   : > { %1145 = vmatmul.bf16.gmra.mxu1 %v1996_v38 }
  0xe3   : > { %1234 = vmatmul.bf16.gmra.mxu2 %v2000_v39 }
  0xe4   : > { %1323 = vmatmul.bf16.gmra.mxu3 %v2004_v40  ;;  %v2064_v40 = vor.u32 %v2343_v29, %v2063_v28 }
  0xf1   : > { %1061 = vmatmul.bf16.gmra.mxu0 %v2008_v49 }
  0xf2   : > { %1150 = vmatmul.bf16.gmra.mxu1 %v2012_v50 }
  0xf3   : > { %1239 = vmatmul.bf16.gmra.mxu2 %v2016_v51  ;;  %v353_v51 = vld [vmem:[#allocation2 + $0xd8] sm:$0xff] }
  0xf4   : > { %1328 = vmatmul.bf16.gmra.mxu3 %v2020_v52 }
 0x101   : > { %1066 = vmatmul.bf16.gmra.mxu0 %v2024_v61  ;;  %v2081_v61 = vld [vmem:[%s3129_s29 + $0x158] sm:$0xf0] }
 0x102   : > { %1155 = vmatmul.bf16.gmra.mxu1 %v2028_v62  ;;  %v2084_v7 = vor.u32 %v2345_v60, %v2081_v61 }
 0x103   : > { %1244 = vmatmul.bf16.gmra.mxu2 %v2032_v63 }
 0x104   : > { %1333 = vmatmul.bf16.gmra.mxu3 %v2036_v0 }
 0x10e   : > { %v1032_v11 = vpop.f32.mrf.mxu0 }
 0x10f   : > { %v1121_v12 = vpop.f32.mrf.mxu1 }
 0x110   : > { %v1122_v15 = vadd.f32 %v1121_v12, %v1032_v11 }
 0x111   : > { %1071 = vmatmul.bf16.gmra.mxu0 %v2040_v9 }
 0x112   : > { %1160 = vmatmul.bf16.gmra.mxu1 %v2044_v10 }
 0x113   : > { %1249 = vmatmul.bf16.gmra.mxu2 %v2048_v13 }
 0x114   : > { %1338 = vmatmul.bf16.gmra.mxu3 %v2052_v14 }
 0x116   : > { %v1210_v16 = vpop.f32.mrf.mxu2  ;;  %v1034_v19 = vpop.f32.mrf.mxu0 }
 0x117   : > { %v1299_v17 = vpop.f32.mrf.mxu3  ;;  %v1211_v18 = vadd.f32 %v1210_v16, %v1122_v15  ;;  %v1123_v20 = vpop.f32.mrf.mxu1 }
 0x118   : > { %v1124_v32 = vadd.f32 %v1123_v20, %v1034_v19  ;;  %v2087_v19 = vld [vmem:[%s3129_s29 + $0x160] sm:$0xf]  ;;  %v2350_v20 = vld [vmem:[%s3129_s29 + $0x16c] sm:$0xf0] }
 0x119   : > { %v1300_v22 = vadd.f32 %v1299_v17, %v1211_v18  ;;  %v355_v17 = vld [vmem:[#allocation2 + $0x50] sm:$0xff]  ;;  %v2088_v31 = vor.u32 %v2350_v20, %v2087_v19  ;;  %v2127_v20 = vld [vmem:[%s3129_s29 + $0x1a8] sm:$0xf] }
 0x11a   : > { %v2121_v19 = vld [vmem:[%s3129_s29 + $0x1b0] sm:$0xf0] }
 0x11b   : > { %v1379_v25 = vadd.f32 %v1300_v22, %v351_v21  ;;  %v2348_v22 = vld [vmem:[%s3129_s29 + $0x164] sm:$0xf] }
 0x11d   : > { %1411 = vst [vmem:[#allocation2 + $0xb0] sm:$0xff] %v1379_v25  ;;  %v2351_v25 = vld [vmem:[%s3129_s29 + $0x174] sm:$0xf0] }
 0x11e   : > { %v1212_v33 = vpop.f32.mrf.mxu2  ;;  %v1037_v38 = vpop.f32.mrf.mxu0 }
 0x11f   : > { %v1301_v34 = vpop.f32.mrf.mxu3  ;;  %v1213_v37 = vadd.f32 %v1212_v33, %v1124_v32  ;;  %v1126_v39 = vpop.f32.mrf.mxu1  ;;  %v2092_v32 = vor.u32 %v2348_v22, %v2089_v23  ;;  %v2357_v22 = vld [vmem:[%s3129_s29 + $0x1ac] sm:$0xf]  ;;  %v2129_v23 = vld [vmem:[%s3129_s29 + $0x1b8] sm:$0xf0] }
 0x120   : > { %v1127_v45 = vadd.f32 %v1126_v39, %v1037_v38  ;;  %v356_v38 = vld [vmem:[#allocation2 + $0x68] sm:$0xff] }
 0x121   : > { %v1302_v43 = vadd.f32 %v1301_v34, %v1213_v37  ;;  %1076 = vmatmul.bf16.gmra.mxu0 %v2056_v35  ;;  %v2100_v37 = vor.u32 %v2349_v26, %v2097_v27 }
 0x122   : > { %1165 = vmatmul.bf16.gmra.mxu1 %v2060_v36  ;;  %v2096_v36 = vor.u32 %v2351_v25, %v2095_v24 }
 0x123   : > { %v1380_v44 = vadd.f32 %v1302_v43, %v352_v42  ;;  %1254 = vmatmul.bf16.gmra.mxu2 %v2064_v40 }
 0x124   : > { %1343 = vmatmul.bf16.gmra.mxu3 %v2068_v41 }
 0x125   : > { %1412 = vst [vmem:[#allocation2] sm:$0xff] %v1380_v44 }
 0x126   : > { %v1215_v46 = vpop.f32.mrf.mxu2  ;;  %v1039_v49 = vpop.f32.mrf.mxu0 }
 0x127   : > { %v1304_v47 = vpop.f32.mrf.mxu3  ;;  %v1216_v48 = vadd.f32 %v1215_v46, %v1127_v45  ;;  %v1128_v50 = vpop.f32.mrf.mxu1 }
 0x128   : > { %v1129_v62 = vadd.f32 %v1128_v50, %v1039_v49  ;;  %v2103_v49 = vld [vmem:[%s3129_s29 + $0x180] sm:$0xf]  ;;  %v2354_v50 = vld [vmem:[%s3129_s29 + $0x18c] sm:$0xf0] }
 0x129   : > { %v1305_v52 = vadd.f32 %v1304_v47, %v1216_v48  ;;  %v357_v47 = vld [vmem:[#allocation2 + $0x30] sm:$0xff]  ;;  %v2104_v61 = vor.u32 %v2354_v50, %v2103_v49  ;;  %v2143_v50 = vld [vmem:[%s3129_s29 + $0x1c8] sm:$0xf] }
 0x12a   : > { %v2137_v49 = vld [vmem:[%s3129_s29 + $0x1d0] sm:$0xf0] }
 0x12b   : > { %v1381_v55 = vadd.f32 %v1305_v52, %v353_v51  ;;  %v2352_v52 = vld [vmem:[%s3129_s29 + $0x184] sm:$0xf] }
 0x12d   : > { %1413 = vst [vmem:[#allocation2 + $0xd8] sm:$0xff] %v1381_v55  ;;  %v2355_v55 = vld [vmem:[%s3129_s29 + $0x194] sm:$0xf0] }
 0x12e   : > { %v1217_v63 = vpop.f32.mrf.mxu2  ;;  %v1042_v4 = vpop.f32.mrf.mxu0 }
 0x12f   : > { %v1306_v0 = vpop.f32.mrf.mxu3  ;;  %v1218_v3 = vadd.f32 %v1217_v63, %v1129_v62  ;;  %v1131_v5 = vpop.f32.mrf.mxu1  ;;  %v2108_v62 = vor.u32 %v2352_v52, %v2105_v53  ;;  %v2361_v52 = vld [vmem:[%s3129_s29 + $0x1cc] sm:$0xf]  ;;  %v2145_v53 = vld [vmem:[%s3129_s29 + $0x1d8] sm:$0xf0] }
 0x130   : > { %v1132_v11 = vadd.f32 %v1131_v5, %v1042_v4  ;;  %v358_v4 = vld [vmem:[#allocation2 + $0x48] sm:$0xff] }
 0x131   : > { %v1307_v9 = vadd.f32 %v1306_v0, %v1218_v3  ;;  %1081 = vmatmul.bf16.gmra.mxu0 %v2072_v1  ;;  %v2116_v3 = vor.u32 %v2353_v56, %v2113_v57 }
 0x132   : > { %1170 = vmatmul.bf16.gmra.mxu1 %v2076_v2  ;;  %v2112_v2 = vor.u32 %v2355_v55, %v2111_v54 }
 0x133   : > { %v1382_v10 = vadd.f32 %v1307_v9, %v354_v8  ;;  %1259 = vmatmul.bf16.gmra.mxu2 %v2080_v6 }
 0x134   : > { %1348 = vmatmul.bf16.gmra.mxu3 %v2084_v7 }
 0x135   : > { %1414 = vst [vmem:[#allocation2 + $0x18] sm:$0xff] %v1382_v10 }
 0x136   : > { %v1220_v12 = vpop.f32.mrf.mxu2  ;;  %v1044_v15 = vpop.f32.mrf.mxu0 }
 0x137   : > { %v1309_v13 = vpop.f32.mrf.mxu3  ;;  %v1221_v14 = vadd.f32 %v1220_v12, %v1132_v11  ;;  %v1133_v16 = vpop.f32.mrf.mxu1 }
 0x138   : > { %v1134_v28 = vadd.f32 %v1133_v16, %v1044_v15  ;;  %v2119_v15 = vld [vmem:[%s3129_s29 + $0x1a0] sm:$0xf]  ;;  %v2358_v16 = vld [vmem:[%s3129_s29 + $0x1ac] sm:$0xf0] }
 0x139   : > { %v1310_v18 = vadd.f32 %v1309_v13, %v1221_v14  ;;  %v359_v13 = vld [vmem:[#allocation2 + $0x80] sm:$0xff]  ;;  %v2120_v27 = vor.u32 %v2358_v16, %v2119_v15  ;;  %v2153_v15 = vld [vmem:[%s3129_s29 + $0x1f0] sm:$0xf0]  ;;  %v2159_v16 = vld [vmem:[%s3129_s29 + $0x1e8] sm:$0xf] }
 0x13b   : > { %v1383_v21 = vadd.f32 %v1310_v18, %v355_v17  ;;  %v2356_v18 = vld [vmem:[%s3129_s29 + $0x1a4] sm:$0xf] }
 0x13d   : > { %1415 = vst [vmem:[#allocation2 + $0x50] sm:$0xff] %v1383_v21  ;;  %v2359_v21 = vld [vmem:[%s3129_s29 + $0x1b4] sm:$0xf0] }
 0x13e   : > { %v1222_v29 = vpop.f32.mrf.mxu2  ;;  %v1047_v34 = vpop.f32.mrf.mxu0 }
 0x13f   : > { %v1311_v30 = vpop.f32.mrf.mxu3  ;;  %v1223_v33 = vadd.f32 %v1222_v29, %v1134_v28  ;;  %v1136_v35 = vpop.f32.mrf.mxu1  ;;  %v2124_v28 = vor.u32 %v2356_v18, %v2121_v19  ;;  %v2365_v18 = vld [vmem:[%s3129_s29 + $0x1ec] sm:$0xf]  ;;  %v2161_v19 = vld [vmem:[%s3129_s29 + $0x1f8] sm:$0xf0] }
 0x140   : > { %v1137_v41 = vadd.f32 %v1136_v35, %v1047_v34  ;;  %v360_v34 = vld [vmem:[#allocation2 + $0x88] sm:$0xff] }
 0x141   : > { %v1312_v39 = vadd.f32 %v1311_v30, %v1223_v33  ;;  %1086 = vmatmul.bf16.gmra.mxu0 %v2088_v31  ;;  %v2132_v33 = vor.u32 %v2357_v22, %v2129_v23 }
 0x142   : > { %1175 = vmatmul.bf16.gmra.mxu1 %v2092_v32  ;;  %v2128_v32 = vor.u32 %v2359_v21, %v2127_v20 }
 0x143   : > { %v1384_v40 = vadd.f32 %v1312_v39, %v356_v38  ;;  %1264 = vmatmul.bf16.gmra.mxu2 %v2096_v36 }
 0x144   : > { %1353 = vmatmul.bf16.gmra.mxu3 %v2100_v37 }
 0x145   : > { %1416 = vst [vmem:[#allocation2 + $0x68] sm:$0xff] %v1384_v40 }
 0x146   : > { %v1225_v42 = vpop.f32.mrf.mxu2  ;;  %v1049_v45 = vpop.f32.mrf.mxu0 }
 0x147   : > { %v1314_v43 = vpop.f32.mrf.mxu3  ;;  %v1226_v44 = vadd.f32 %v1225_v42, %v1137_v41  ;;  %v1138_v46 = vpop.f32.mrf.mxu1 }
 0x148   : > { %v1139_v58 = vadd.f32 %v1138_v46, %v1049_v45  ;;  %v2135_v45 = vld [vmem:[%s3129_s29 + $0x1c0] sm:$0xf]  ;;  %v2362_v46 = vld [vmem:[%s3129_s29 + $0x1cc] sm:$0xf0] }
 0x149   : > { %v1315_v48 = vadd.f32 %v1314_v43, %v1226_v44  ;;  %v361_v43 = vld [vmem:[#allocation2 + $0xe8] sm:$0xff]  ;;  %v2136_v57 = vor.u32 %v2362_v46, %v2135_v45 }
 0x14b   : > { %v1385_v51 = vadd.f32 %v1315_v48, %v357_v47  ;;  %v2360_v48 = vld [vmem:[%s3129_s29 + $0x1c4] sm:$0xf] }
 0x14d   : > { %1417 = vst [vmem:[#allocation2 + $0x30] sm:$0xff] %v1385_v51  ;;  %v2363_v51 = vld [vmem:[%s3129_s29 + $0x1d4] sm:$0xf0] }
 0x14e   : > { %v1227_v59 = vpop.f32.mrf.mxu2  ;;  %v1052_v0 = vpop.f32.mrf.mxu0 }
 0x14f   : > { %v1316_v60 = vpop.f32.mrf.mxu3  ;;  %v1228_v63 = vadd.f32 %v1227_v59, %v1139_v58  ;;  %v1141_v1 = vpop.f32.mrf.mxu1  ;;  %v2140_v58 = vor.u32 %v2360_v48, %v2137_v49  ;;  %v366_v48 = vld [vmem:[#allocation2 + $0x78] sm:$0xff] }
 0x150   : > { %v1142_v7 = vadd.f32 %v1141_v1, %v1052_v0  ;;  %v362_v0 = vld [vmem:[#allocation2 + $0xb8] sm:$0xff] }
 0x151   : > { %v1317_v5 = vadd.f32 %v1316_v60, %v1228_v63  ;;  %1091 = vmatmul.bf16.gmra.mxu0 %v2104_v61  ;;  %v2148_v63 = vor.u32 %v2361_v52, %v2145_v53 }
 0x152   : > { %1180 = vmatmul.bf16.gmra.mxu1 %v2108_v62  ;;  %v2144_v62 = vor.u32 %v2363_v51, %v2143_v50 }
 0x153   : > { %v1386_v6 = vadd.f32 %v1317_v5, %v358_v4  ;;  %1269 = vmatmul.bf16.gmra.mxu2 %v2112_v2 }
 0x154   : > { %1358 = vmatmul.bf16.gmra.mxu3 %v2116_v3 }
 0x155   : > { %1418 = vst [vmem:[#allocation2 + $0x48] sm:$0xff] %v1386_v6 }
 0x156   : > { %v1230_v8 = vpop.f32.mrf.mxu2  ;;  %v1054_v11 = vpop.f32.mrf.mxu0 }
 0x157   : > { %v1319_v9 = vpop.f32.mrf.mxu3  ;;  %v1231_v10 = vadd.f32 %v1230_v8, %v1142_v7  ;;  %v1143_v12 = vpop.f32.mrf.mxu1 }
 0x158   : > { %v1144_v24 = vadd.f32 %v1143_v12, %v1054_v11  ;;  %v2151_v11 = vld [vmem:[%s3129_s29 + $0x1e0] sm:$0xf]  ;;  %v2366_v12 = vld [vmem:[%s3129_s29 + $0x1ec] sm:$0xf0] }
 0x159   : > { %v1320_v14 = vadd.f32 %v1319_v9, %v1231_v10  ;;  %v363_v9 = vld [vmem:[#allocation2 + $0x60] sm:$0xff]  ;;  %v2152_v23 = vor.u32 %v2366_v12, %v2151_v11 }
 0x15a   : > { %v369_v11 = vld [vmem:[#allocation2 + $0x40] sm:$0xff] }
 0x15b   : > { %v1387_v17 = vadd.f32 %v1320_v14, %v359_v13  ;;  %v2364_v14 = vld [vmem:[%s3129_s29 + $0x1e4] sm:$0xf] }
 0x15d   : > { %1419 = vst [vmem:[#allocation2 + $0x80] sm:$0xff] %v1387_v17  ;;  %v2367_v17 = vld [vmem:[%s3129_s29 + $0x1f4] sm:$0xf0] }
 0x15e   : > { %v1232_v25 = vpop.f32.mrf.mxu2  ;;  %v1057_v30 = vpop.f32.mrf.mxu0 }
 0x15f   : > { %v1321_v26 = vpop.f32.mrf.mxu3  ;;  %v1233_v29 = vadd.f32 %v1232_v25, %v1144_v24  ;;  %v1146_v31 = vpop.f32.mrf.mxu1  ;;  %v2156_v24 = vor.u32 %v2364_v14, %v2153_v15 }
 0x160   : > { %v1147_v37 = vadd.f32 %v1146_v31, %v1057_v30  ;;  %v364_v30 = vld [vmem:[#allocation2 + $0xf0] sm:$0xff] }
 0x161   : > { %v1322_v35 = vadd.f32 %v1321_v26, %v1233_v29  ;;  %1096 = vmatmul.bf16.gmra.mxu0 %v2120_v27  ;;  %v2164_v29 = vor.u32 %v2365_v18, %v2161_v19 }
 0x162   : > { %1185 = vmatmul.bf16.gmra.mxu1 %v2124_v28  ;;  %v2160_v28 = vor.u32 %v2367_v17, %v2159_v16 }
 0x163   : > { %v1388_v36 = vadd.f32 %v1322_v35, %v360_v34  ;;  %1274 = vmatmul.bf16.gmra.mxu2 %v2128_v32 }
 0x164   : > { %1363 = vmatmul.bf16.gmra.mxu3 %v2132_v33 }
 0x165   : > { %1420 = vst [vmem:[#allocation2 + $0x88] sm:$0xff] %v1388_v36 }
 0x166   : > { %v1235_v38 = vpop.f32.mrf.mxu2  ;;  %v1059_v41 = vpop.f32.mrf.mxu0 }
 0x167   : > { %v1324_v39 = vpop.f32.mrf.mxu3  ;;  %v1236_v40 = vadd.f32 %v1235_v38, %v1147_v37  ;;  %v1148_v42 = vpop.f32.mrf.mxu1 }
 0x168   : > { %v1149_v54 = vadd.f32 %v1148_v42, %v1059_v41 }
 0x169   : > { %v1325_v44 = vadd.f32 %v1324_v39, %v1236_v40  ;;  %v365_v39 = vld [vmem:[#allocation2 + $0x8] sm:$0xff] }
 0x16b   : > { %v1389_v47 = vadd.f32 %v1325_v44, %v361_v43 }
 0x16d   : > { %1421 = vst [vmem:[#allocation2 + $0xe8] sm:$0xff] %v1389_v47 }
 0x16e   : > { %v1237_v55 = vpop.f32.mrf.mxu2  ;;  %v1062_v60 = vpop.f32.mrf.mxu0 }
 0x16f   : > { %v1326_v56 = vpop.f32.mrf.mxu3  ;;  %v1238_v59 = vadd.f32 %v1237_v55, %v1149_v54  ;;  %v1151_v61 = vpop.f32.mrf.mxu1 }
 0x170   : > { %v1152_v3 = vadd.f32 %v1151_v61, %v1062_v60 }
 0x171   : > { %v1327_v1 = vadd.f32 %v1326_v56, %v1238_v59  ;;  %1101 = vmatmul.bf16.gmra.mxu0 %v2136_v57  ;;  %v367_v57 = vld [vmem:[#allocation2 + $0x38] sm:$0xff] }
 0x172   : > { %1190 = vmatmul.bf16.gmra.mxu1 %v2140_v58 }
 0x173   : > { %v1390_v2 = vadd.f32 %v1327_v1, %v362_v0  ;;  %1279 = vmatmul.bf16.gmra.mxu2 %v2144_v62 }
 0x174   : > { %1368 = vmatmul.bf16.gmra.mxu3 %v2148_v63 }
 0x175   : > { %1422 = vst [vmem:[#allocation2 + $0xb8] sm:$0xff] %v1390_v2  ;;  %v368_v2 = vld [vmem:[#allocation2 + $0x58] sm:$0xff] }
 0x176   : > { %v1240_v4 = vpop.f32.mrf.mxu2  ;;  %v1064_v7 = vpop.f32.mrf.mxu0 }
 0x177   : > { %v1329_v5 = vpop.f32.mrf.mxu3  ;;  %v1241_v6 = vadd.f32 %v1240_v4, %v1152_v3  ;;  %v1153_v8 = vpop.f32.mrf.mxu1 }
 0x178   : > { %v1154_v20 = vadd.f32 %v1153_v8, %v1064_v7 }
 0x179   : > { %v1330_v10 = vadd.f32 %v1329_v5, %v1241_v6 }
 0x17b   : > { %v1391_v13 = vadd.f32 %v1330_v10, %v363_v9 }
 0x17d   : > { %1423 = vst [vmem:[#allocation2 + $0x60] sm:$0xff] %v1391_v13 }
 0x17e   : > { %v1242_v21 = vpop.f32.mrf.mxu2  ;;  %v1067_v26 = vpop.f32.mrf.mxu0 }
 0x17f   : > { %v1331_v22 = vpop.f32.mrf.mxu3  ;;  %v1243_v25 = vadd.f32 %v1242_v21, %v1154_v20  ;;  %v1156_v27 = vpop.f32.mrf.mxu1  ;;  %v370_v20 = vld [vmem:[#allocation2 + $0xc8] sm:$0xff] }
 0x180   : > { %v1157_v33 = vadd.f32 %v1156_v27, %v1067_v26 }
 0x181   : > { %v1332_v31 = vadd.f32 %v1331_v22, %v1243_v25  ;;  %1106 = vmatmul.bf16.gmra.mxu0 %v2152_v23 }
 0x182   : > { %1195 = vmatmul.bf16.gmra.mxu1 %v2156_v24 }
 0x183   : > { %v1392_v32 = vadd.f32 %v1332_v31, %v364_v30  ;;  %1284 = vmatmul.bf16.gmra.mxu2 %v2160_v28 }
 0x184   : > { %1373 = vmatmul.bf16.gmra.mxu3 %v2164_v29  ;;  %v371_v29 = vld [vmem:[#allocation2 + $0xe0] sm:$0xff] }
 0x185   : > { %1424 = vst [vmem:[#allocation2 + $0xf0] sm:$0xff] %v1392_v32 }
 0x186   : > { %v1245_v34 = vpop.f32.mrf.mxu2  ;;  %v1069_v37 = vpop.f32.mrf.mxu0 }
 0x187   : > { %v1334_v35 = vpop.f32.mrf.mxu3  ;;  %v1246_v36 = vadd.f32 %v1245_v34, %v1157_v33  ;;  %v1158_v38 = vpop.f32.mrf.mxu1 }
 0x188   : > { %v1159_v42 = vadd.f32 %v1158_v38, %v1069_v37  ;;  %v372_v38 = vld [vmem:[#allocation2 + $0x90] sm:$0xff] }
 0x189   : > { %v1335_v40 = vadd.f32 %v1334_v35, %v1246_v36 }
 0x18b   : > { %v1393_v41 = vadd.f32 %v1335_v40, %v365_v39 }
 0x18d   : > { %1425 = vst [vmem:[#allocation2 + $0x8] sm:$0xff] %v1393_v41 }
 0x18e   : > { %v1247_v43 = vpop.f32.mrf.mxu2  ;;  %v1072_v46 = vpop.f32.mrf.mxu0 }
 0x18f   : > { %v1336_v44 = vpop.f32.mrf.mxu3  ;;  %v1248_v45 = vadd.f32 %v1247_v43, %v1159_v42  ;;  %v1161_v47 = vpop.f32.mrf.mxu1 }
 0x190   : > { %v1162_v51 = vadd.f32 %v1161_v47, %v1072_v46  ;;  %v373_v47 = vld [vmem:[#allocation2 + $0x70] sm:$0xff] }
 0x191   : > { %v1337_v49 = vadd.f32 %v1336_v44, %v1248_v45 }
 0x193   : > { %v1394_v50 = vadd.f32 %v1337_v49, %v366_v48 }
 0x195   : > { %1426 = vst [vmem:[#allocation2 + $0x78] sm:$0xff] %v1394_v50 }
 0x196   : > { %v1250_v52 = vpop.f32.mrf.mxu2  ;;  %v1074_v55 = vpop.f32.mrf.mxu0 }
 0x197   : > { %v1339_v53 = vpop.f32.mrf.mxu3  ;;  %v1251_v54 = vadd.f32 %v1250_v52, %v1162_v51  ;;  %v1163_v56 = vpop.f32.mrf.mxu1 }
 0x198   : > { %v1164_v60 = vadd.f32 %v1163_v56, %v1074_v55  ;;  %v374_v56 = vld [vmem:[#allocation2 + $0xc0] sm:$0xff] }
 0x199   : > { %v1340_v58 = vadd.f32 %v1339_v53, %v1251_v54 }
 0x19b   : > { %v1395_v59 = vadd.f32 %v1340_v58, %v367_v57 }
 0x19d   : > { %1427 = vst [vmem:[#allocation2 + $0x38] sm:$0xff] %v1395_v59 }
 0x19e   : > { %v1252_v61 = vpop.f32.mrf.mxu2  ;;  %v1077_v0 = vpop.f32.mrf.mxu0 }
 0x19f   : > { %v1341_v62 = vpop.f32.mrf.mxu3  ;;  %v1253_v63 = vadd.f32 %v1252_v61, %v1164_v60  ;;  %v1166_v1 = vpop.f32.mrf.mxu1 }
 0x1a0   : > { %v1167_v5 = vadd.f32 %v1166_v1, %v1077_v0  ;;  %v375_v1 = vld [vmem:[#allocation2 + $0xa8] sm:$0xff] }
 0x1a1   : > { %v1342_v3 = vadd.f32 %v1341_v62, %v1253_v63 }
 0x1a3   : > { %v1396_v4 = vadd.f32 %v1342_v3, %v368_v2 }
 0x1a5   : > { %1428 = vst [vmem:[#allocation2 + $0x58] sm:$0xff] %v1396_v4 }
 0x1a6   : > { %v1255_v6 = vpop.f32.mrf.mxu2  ;;  %v1079_v9 = vpop.f32.mrf.mxu0 }
 0x1a7   : > { %v1344_v7 = vpop.f32.mrf.mxu3  ;;  %v1256_v8 = vadd.f32 %v1255_v6, %v1167_v5  ;;  %v1168_v10 = vpop.f32.mrf.mxu1 }
 0x1a8   : > { %v1169_v14 = vadd.f32 %v1168_v10, %v1079_v9  ;;  %v376_v10 = vld [vmem:[#allocation2 + $0xd0] sm:$0xff] }
 0x1a9   : > { %v1345_v12 = vadd.f32 %v1344_v7, %v1256_v8 }
 0x1ab   : > { %v1397_v13 = vadd.f32 %v1345_v12, %v369_v11 }
 0x1ad   : > { %1429 = vst [vmem:[#allocation2 + $0x40] sm:$0xff] %v1397_v13 }
 0x1ae   : > { %v1257_v15 = vpop.f32.mrf.mxu2  ;;  %v1082_v18 = vpop.f32.mrf.mxu0 }
 0x1af   : > { %v1346_v16 = vpop.f32.mrf.mxu3  ;;  %v1258_v17 = vadd.f32 %v1257_v15, %v1169_v14  ;;  %v1171_v19 = vpop.f32.mrf.mxu1 }
 0x1b0   : > { %v1172_v23 = vadd.f32 %v1171_v19, %v1082_v18  ;;  %v377_v19 = vld [vmem:[#allocation2 + $0x10] sm:$0xff] }
 0x1b1   : > { %v1347_v21 = vadd.f32 %v1346_v16, %v1258_v17 }
 0x1b3   : > { %v1398_v22 = vadd.f32 %v1347_v21, %v370_v20 }
 0x1b5   : > { %1430 = vst [vmem:[#allocation2 + $0xc8] sm:$0xff] %v1398_v22 }
 0x1b6   : > { %v1260_v24 = vpop.f32.mrf.mxu2  ;;  %v1084_v27 = vpop.f32.mrf.mxu0 }
 0x1b7   : > { %v1349_v25 = vpop.f32.mrf.mxu3  ;;  %v1261_v26 = vadd.f32 %v1260_v24, %v1172_v23  ;;  %v1173_v28 = vpop.f32.mrf.mxu1 }
 0x1b8   : > { %v1174_v32 = vadd.f32 %v1173_v28, %v1084_v27  ;;  %v378_v28 = vld [vmem:[#allocation2 + $0x28] sm:$0xff] }
 0x1b9   : > { %v1350_v30 = vadd.f32 %v1349_v25, %v1261_v26 }
 0x1bb   : > { %v1399_v31 = vadd.f32 %v1350_v30, %v371_v29 }
 0x1bd   : > { %1431 = vst [vmem:[#allocation2 + $0xe0] sm:$0xff] %v1399_v31 }
 0x1be   : > { %v1262_v33 = vpop.f32.mrf.mxu2  ;;  %v1087_v36 = vpop.f32.mrf.mxu0 }
 0x1bf   : > { %v1351_v34 = vpop.f32.mrf.mxu3  ;;  %v1263_v35 = vadd.f32 %v1262_v33, %v1174_v32  ;;  %v1176_v37 = vpop.f32.mrf.mxu1 }
 0x1c0   : > { %v1177_v41 = vadd.f32 %v1176_v37, %v1087_v36  ;;  %v379_v37 = vld [vmem:[#allocation2 + $0xa0] sm:$0xff] }
 0x1c1   : > { %v1352_v39 = vadd.f32 %v1351_v34, %v1263_v35 }
 0x1c3   : > { %v1400_v40 = vadd.f32 %v1352_v39, %v372_v38 }
 0x1c5   : > { %1432 = vst [vmem:[#allocation2 + $0x90] sm:$0xff] %v1400_v40 }
 0x1c6   : > { %v1265_v42 = vpop.f32.mrf.mxu2  ;;  %v1089_v45 = vpop.f32.mrf.mxu0 }
 0x1c7   : > { %v1354_v43 = vpop.f32.mrf.mxu3  ;;  %v1266_v44 = vadd.f32 %v1265_v42, %v1177_v41  ;;  %v1178_v46 = vpop.f32.mrf.mxu1 }
 0x1c8   : > { %v1179_v50 = vadd.f32 %v1178_v46, %v1089_v45 }
 0x1c9   : > { %v1355_v48 = vadd.f32 %v1354_v43, %v1266_v44  ;;  %v380_v44 = vld [vmem:[#allocation2 + $0xf8] sm:$0xff] }
 0x1cb   : > { %v1401_v49 = vadd.f32 %v1355_v48, %v373_v47 }
 0x1cd   : > { %1433 = vst [vmem:[#allocation2 + $0x70] sm:$0xff] %v1401_v49 }
 0x1ce   : > { %v1267_v51 = vpop.f32.mrf.mxu2  ;;  %v1092_v54 = vpop.f32.mrf.mxu0 }
 0x1cf   : > { %v1356_v52 = vpop.f32.mrf.mxu3  ;;  %v1268_v53 = vadd.f32 %v1267_v51, %v1179_v50  ;;  %v1181_v55 = vpop.f32.mrf.mxu1 }
 0x1d0   : > { %v1182_v59 = vadd.f32 %v1181_v55, %v1092_v54 }
 0x1d1   : > { %v1357_v57 = vadd.f32 %v1356_v52, %v1268_v53  ;;  %v381_v53 = vld [vmem:[#allocation2 + $0x20] sm:$0xff] }
 0x1d3   : > { %v1402_v58 = vadd.f32 %v1357_v57, %v374_v56 }
 0x1d5   : > { %1434 = vst [vmem:[#allocation2 + $0xc0] sm:$0xff] %v1402_v58 }
 0x1d6   : > { %v1270_v60 = vpop.f32.mrf.mxu2  ;;  %v1094_v63 = vpop.f32.mrf.mxu0 }
 0x1d7   : > { %v1359_v61 = vpop.f32.mrf.mxu3  ;;  %v1271_v62 = vadd.f32 %v1270_v60, %v1182_v59  ;;  %v1183_v0 = vpop.f32.mrf.mxu1 }
 0x1d8   : > { %v1184_v4 = vadd.f32 %v1183_v0, %v1094_v63 }
 0x1d9   : > { %v1360_v2 = vadd.f32 %v1359_v61, %v1271_v62  ;;  %v382_v61 = vld [vmem:[#allocation2 + $0x98] sm:$0xff] }
 0x1db   : > { %v1403_v3 = vadd.f32 %v1360_v2, %v375_v1 }
 0x1dd   : > { %1435 = vst [vmem:[#allocation2 + $0xa8] sm:$0xff] %v1403_v3 }
 0x1de   : > { %v1272_v5 = vpop.f32.mrf.mxu2  ;;  %v1097_v8 = vpop.f32.mrf.mxu0 }
 0x1df   : > { %v1361_v6 = vpop.f32.mrf.mxu3  ;;  %v1273_v7 = vadd.f32 %v1272_v5, %v1184_v4  ;;  %v1186_v9 = vpop.f32.mrf.mxu1 }
 0x1e0   : > { %v1187_v13 = vadd.f32 %v1186_v9, %v1097_v8 }
 0x1e1   : > { %v1362_v11 = vadd.f32 %v1361_v6, %v1273_v7 }
 0x1e3   : > { %v1404_v12 = vadd.f32 %v1362_v11, %v376_v10 }
 0x1e5   : > { %1436 = vst [vmem:[#allocation2 + $0xd0] sm:$0xff] %v1404_v12 }
 0x1e6   : > { %v1275_v14 = vpop.f32.mrf.mxu2  ;;  %v1099_v17 = vpop.f32.mrf.mxu0 }
 0x1e7   : > { %v1364_v15 = vpop.f32.mrf.mxu3  ;;  %v1276_v16 = vadd.f32 %v1275_v14, %v1187_v13  ;;  %v1188_v18 = vpop.f32.mrf.mxu1 }
 0x1e8   : > { %v1189_v22 = vadd.f32 %v1188_v18, %v1099_v17 }
 0x1e9   : > { %v1365_v20 = vadd.f32 %v1364_v15, %v1276_v16 }
 0x1eb   : > { %v1405_v21 = vadd.f32 %v1365_v20, %v377_v19 }
 0x1ed   : > { %1437 = vst [vmem:[#allocation2 + $0x10] sm:$0xff] %v1405_v21 }
 0x1ee   : > { %v1277_v23 = vpop.f32.mrf.mxu2  ;;  %v1102_v26 = vpop.f32.mrf.mxu0 }
 0x1ef   : > { %v1366_v24 = vpop.f32.mrf.mxu3  ;;  %v1278_v25 = vadd.f32 %v1277_v23, %v1189_v22  ;;  %v1191_v27 = vpop.f32.mrf.mxu1 }
 0x1f0   : > { %v1192_v31 = vadd.f32 %v1191_v27, %v1102_v26 }
 0x1f1   : > { %v1367_v29 = vadd.f32 %v1366_v24, %v1278_v25 }
 0x1f3   : > { %v1406_v30 = vadd.f32 %v1367_v29, %v378_v28 }
 0x1f5   : > { %1438 = vst [vmem:[#allocation2 + $0x28] sm:$0xff] %v1406_v30 }
 0x1f6   : > { %v1280_v32 = vpop.f32.mrf.mxu2  ;;  %v1104_v35 = vpop.f32.mrf.mxu0 }
 0x1f7   : > { %v1369_v33 = vpop.f32.mrf.mxu3  ;;  %v1281_v34 = vadd.f32 %v1280_v32, %v1192_v31  ;;  %v1193_v36 = vpop.f32.mrf.mxu1 }
 0x1f8   : > { %v1194_v40 = vadd.f32 %v1193_v36, %v1104_v35 }
 0x1f9   : > { %v1370_v38 = vadd.f32 %v1369_v33, %v1281_v34 }
 0x1fb   : > { %v1407_v39 = vadd.f32 %v1370_v38, %v379_v37 }
 0x1fd   : > { %1439 = vst [vmem:[#allocation2 + $0xa0] sm:$0xff] %v1407_v39 }
 0x1fe   : > { %v1282_v41 = vpop.f32.mrf.mxu2  ;;  %v1107_v45 = vpop.f32.mrf.mxu0 }
 0x1ff   : > { %v1371_v42 = vpop.f32.mrf.mxu3  ;;  %v1283_v43 = vadd.f32 %v1282_v41, %v1194_v40  ;;  %v1196_v46 = vpop.f32.mrf.mxu1 }
 0x200   : > { %v1197_v49 = vadd.f32 %v1196_v46, %v1107_v45 }
 0x201   : > { %v1372_v47 = vadd.f32 %v1371_v42, %v1283_v43 }
 0x203   : > { %v1408_v48 = vadd.f32 %v1372_v47, %v380_v44 }
 0x205   : > { %1440 = vst [vmem:[#allocation2 + $0xf8] sm:$0xff] %v1408_v48 }
 0x206   : > { %v1285_v50 = vpop.f32.mrf.mxu2  ;;  %v1109_v55 = vpop.f32.mrf.mxu0 }
 0x207   : > { %v1374_v51 = vpop.f32.mrf.mxu3  ;;  %v1286_v52 = vadd.f32 %v1285_v50, %v1197_v49  ;;  %v1198_v56 = vpop.f32.mrf.mxu1 }
 0x208   : > { %v1199_v58 = vadd.f32 %v1198_v56, %v1109_v55 }
 0x209   : > { %v1375_v54 = vadd.f32 %v1374_v51, %v1286_v52 }
 0x20b   : > { %v1409_v57 = vadd.f32 %v1375_v54, %v381_v53 }
 0x20d   : > { %1441 = vst [vmem:[#allocation2 + $0x20] sm:$0xff] %v1409_v57 }
 0x20e   : > { %v1287_v59 = vpop.f32.mrf.mxu2 }
 0x20f   : > { %v1288_v60 = vadd.f32 %v1287_v59, %v1199_v58  ;;  %v1376_v62 = vpop.f32.mrf.mxu3 }
 0x211   : > { %v1377_v63 = vadd.f32 %v1376_v62, %v1288_v60  ;;  %1446 = sbr.rel (%p2293_p1) target bundleno = 612 (0x264), region = 44 }
 0x213   : > { %v1410_v0 = vadd.f32 %v1377_v63, %v382_v61 }
 0x215   : > { %1442 = vst [vmem:[#allocation2 + $0x98] sm:$0xff] %v1410_v0 }
 0x216   : > { %v1447_v1 = vld [vmem:[#allocation2 + $0xb0] sm:$0xff]  ;;  %v1448_v2 = vld [vmem:[#allocation2] sm:$0xff]  ;;  %v1449_v3 = vld [vmem:[#allocation2 + $0xd8] sm:$0xff] }
 0x217   : > { %v2404_v4 = vpack.c.bf16 %v1448_v2, %v1447_v1  ;;  %v1543_v5 = vadd.f32 %v1448_v2, %v1447_v1  ;;  %v1580_v6 = vmul.f32 %v1447_v1, %v1447_v1  ;;  %v1581_v7 = vmul.f32 %v1448_v2, %v1448_v2  ;;  %v1450_v8 = vld [vmem:[#allocation2 + $0x18] sm:$0xff]  ;;  %v1451_v9 = vld [vmem:[#allocation2 + $0x50] sm:$0xff]  ;;  %v1452_v10 = vld [vmem:[#allocation2 + $0x68] sm:$0xff] }
 0x218   : > { %v2409_v11 = vpack.c.bf16 %v1450_v8, %v1449_v3  ;;  %v1582_v12 = vmul.f32 %v1449_v3, %v1449_v3  ;;  %v2414_v13 = vpack.c.bf16 %v1452_v10, %v1451_v9  ;;  %v1453_v14 = vld [vmem:[#allocation2 + $0x30] sm:$0xff]  ;;  %v1583_v17 = vmul.f32 %v1450_v8, %v1450_v8  ;;  %v1454_v18 = vld [vmem:[#allocation2 + $0x48] sm:$0xff]  ;;  %v1455_v19 = vld [vmem:[#allocation2 + $0x80] sm:$0xff] }
 0x219   : > { %2405 = vst [vmem:[%s3147_s9] sm:$0xff] %v2404_v4   ;;  %v1612_v15 = vadd.f32 %v1581_v7, %v1580_v6  ;;  %v1544_v16 = vadd.f32 %v1543_v5, %v1449_v3  ;;  %v1456_v20 = vld [vmem:[#allocation2 + $0x88] sm:$0xff]  ;;  %v2419_v21 = vpack.c.bf16 %v1454_v18, %v1453_v14  ;;  %v1584_v26 = vmul.f32 %v1451_v9, %v1451_v9  ;;  %v1458_v27 = vld [vmem:[#allocation2 + $0xb8] sm:$0xff]  ;;  %v1459_v28 = vld [vmem:[#allocation2 + $0x60] sm:$0xff] }
 0x21a   : > { %2481 = vst [vmem:[%s3147_s9 + $0x8] sm:$0xff] %v2409_v11   ;;  %v2424_v22 = vpack.c.bf16 %v1456_v20, %v1455_v19  ;;  %v1457_v23 = vld [vmem:[#allocation2 + $0xe8] sm:$0xff]  ;;  %v3318_v29 = vld [vmem:[#allocation2 + $0xf0] sm:$0xff]  ;;  %v1585_v35 = vmul.f32 %v1452_v10, %v1452_v10  ;;  %v3325_v36 = vld [vmem:[#allocation2 + $0x78] sm:$0xff]  ;;  %v1586_v44 = vmul.f32 %v1453_v14, %v1453_v14  ;;  %v1587_v52 = vmul.f32 %v1454_v18, %v1454_v18 }
 0x21b   : > { %v1545_v24 = vadd.f32 %v1544_v16, %v1450_v8  ;;  %v1613_v25 = vadd.f32 %v1612_v15, %v1582_v12  ;;  %2482 = vst [vmem:[%s3147_s9 + $0x10] sm:$0xff] %v2414_v13   ;;  %v2429_v30 = vpack.c.bf16 %v1458_v27, %v1457_v23  ;;  %v2434_v31 = vpack.c.bf16 %v3318_v29, %v1459_v28  ;;  %v3322_v32 = vld [vmem:[#allocation2 + $0x8] sm:$0xff]  ;;  %v3327_v37 = vld [vmem:[#allocation2 + $0x38] sm:$0xff]  ;;  %v3336_v41 = vld [vmem:[#allocation2 + $0x40] sm:$0xff] }
 0x21c   : > { %2483 = vst [vmem:[%s3147_s9 + $0x18] sm:$0xff] %v2419_v21   ;;  %v3329_v38 = vld [vmem:[#allocation2 + $0x58] sm:$0xff]  ;;  %v2439_v39 = vpack.c.bf16 %v3325_v36, %v3322_v32  ;;  %v3339_v45 = vld [vmem:[#allocation2 + $0xc8] sm:$0xff]  ;;  %v3341_v46 = vld [vmem:[#allocation2 + $0xe0] sm:$0xff]  ;;  %v1588_v58 = vmul.f32 %v1455_v19, %v1455_v19  ;;  %v1589_v61 = vmul.f32 %v1456_v20, %v1456_v20  ;;  %v1590_v3 = vmul.f32 %v1457_v23, %v1457_v23 }
 0x21d   : > { %v1614_v33 = vadd.f32 %v1613_v25, %v1583_v17  ;;  %v1546_v34 = vadd.f32 %v1545_v24, %v1451_v9  ;;  %2484 = vst [vmem:[%s3147_s9 + $0x20] sm:$0xff] %v2424_v22   ;;  %v2444_v40 = vpack.c.bf16 %v3329_v38, %v3327_v37  ;;  %v3343_v47 = vld [vmem:[#allocation2 + $0x90] sm:$0xff]  ;;  %v2449_v48 = vpack.c.bf16 %v3339_v45, %v3336_v41  ;;  %v3353_v54 = vld [vmem:[#allocation2 + $0xc0] sm:$0xff]  ;;  %v1471_v62 = vld [vmem:[#allocation2 + $0xa8] sm:$0xff] }
 0x21e   : > { %2485 = vst [vmem:[%s3147_s9 + $0x28] sm:$0xff] %v2429_v30   ;;  %v2454_v49 = vpack.c.bf16 %v3343_v47, %v3341_v46  ;;  %v3351_v53 = vld [vmem:[#allocation2 + $0x70] sm:$0xff]  ;;  %v1591_v6 = vmul.f32 %v1458_v27, %v1458_v27  ;;  %v1474_v8 = vld [vmem:[#allocation2 + $0x28] sm:$0xff]  ;;  %v1592_v12 = vmul.f32 %v1459_v28, %v1459_v28  ;;  %v1593_v15 = vmul.f32 %v3318_v29, %v3318_v29  ;;  %v1475_v16 = vld [vmem:[#allocation2 + $0xa0] sm:$0xff] }
 0x21f   : > { %v1547_v42 = vadd.f32 %v1546_v34, %v1452_v10  ;;  %v1615_v43 = vadd.f32 %v1614_v33, %v1584_v26  ;;  %2486 = vst [vmem:[%s3147_s9 + $0x30] sm:$0xff] %v2434_v31   ;;  %v2459_v55 = vpack.c.bf16 %v3353_v54, %v3351_v53  ;;  %v3360_v63 = vld [vmem:[#allocation2 + $0xd0] sm:$0xff]  ;;  %v1476_v17 = vld [vmem:[#allocation2 + $0xf8] sm:$0xff]  ;;  %v1594_v21 = vmul.f32 %v3322_v32, %v3322_v32  ;;  %v1477_v25 = vld [vmem:[#allocation2 + $0x20] sm:$0xff] }
 0x220   : > { %2487 = vst [vmem:[%s3147_s9 + $0x38] sm:$0xff] %v2439_v39   ;;  %v2464_v0 = vpack.c.bf16 %v3360_v63, %v1471_v62  ;;  %v1473_v7 = vld [vmem:[#allocation2 + $0x10] sm:$0xff]  ;;  %v1595_v24 = vmul.f32 %v3325_v36, %v3325_v36  ;;  %v1478_v26 = vld [vmem:[#allocation2 + $0x98] sm:$0xff]  ;;  %v1597_v34 = vmul.f32 %v3329_v38, %v3329_v38  ;;  %v1598_v39 = vmul.f32 %v3336_v41, %v3336_v41 }
 0x221   : > { %v1616_v50 = vadd.f32 %v1615_v43, %v1585_v35  ;;  %v1548_v51 = vadd.f32 %v1547_v42, %v1453_v14  ;;  %2488 = vst [vmem:[%s3147_s9 + $0x40] sm:$0xff] %v2444_v40   ;;  %v2469_v9 = vpack.c.bf16 %v1474_v8, %v1473_v7  ;;  %v1599_v42 = vmul.f32 %v3339_v45, %v3339_v45 }
 0x222   : > { %2489 = vst [vmem:[%s3147_s9 + $0x48] sm:$0xff] %v2449_v48  }
 0x223   : > { %v1549_v56 = vadd.f32 %v1548_v51, %v1454_v18  ;;  %v1617_v57 = vadd.f32 %v1616_v50, %v1586_v44  ;;  %2490 = vst [vmem:[%s3147_s9 + $0x50] sm:$0xff] %v2454_v49   ;;  %v2474_v18 = vpack.c.bf16 %v1476_v17, %v1475_v16 }
 0x224   : > { %2491 = vst [vmem:[%s3147_s9 + $0x58] sm:$0xff] %v2459_v55  }
 0x225   : > { %v1618_v59 = vadd.f32 %v1617_v57, %v1587_v52  ;;  %v1550_v60 = vadd.f32 %v1549_v56, %v1455_v19  ;;  %2492 = vst [vmem:[%s3147_s9 + $0x60] sm:$0xff] %v2464_v0   ;;  %v1606_v0 = vmul.f32 %v1473_v7, %v1473_v7 }
 0x226   : > { %2493 = vst [vmem:[%s3147_s9 + $0x68] sm:$0xff] %v2469_v9  }
 0x227   : > { %v1551_v1 = vadd.f32 %v1550_v60, %v1456_v20  ;;  %v1619_v2 = vadd.f32 %v1618_v59, %v1588_v58  ;;  %2494 = vst [vmem:[%s3147_s9 + $0x70] sm:$0xff] %v2474_v18   ;;  %v1604_v58 = vmul.f32 %v1471_v62, %v1471_v62  ;;  %v1605_v60 = vmul.f32 %v3360_v63, %v3360_v63 }
 0x229   : > { %v1620_v4 = vadd.f32 %v1619_v2, %v1589_v61  ;;  %v1552_v5 = vadd.f32 %v1551_v1, %v1457_v23 }
 0x22b   : > { %v1553_v10 = vadd.f32 %v1552_v5, %v1458_v27  ;;  %v1621_v11 = vadd.f32 %v1620_v4, %v1590_v3  ;;  %v2479_v27 = vpack.c.bf16 %v1478_v26, %v1477_v25  ;;  %v1607_v3 = vmul.f32 %v1474_v8, %v1474_v8 }
 0x22c   : > { %v1608_v5 = vmul.f32 %v1475_v16, %v1475_v16 }
 0x22d   : > { %v1622_v13 = vadd.f32 %v1621_v11, %v1591_v6  ;;  %v1554_v14 = vadd.f32 %v1553_v10, %v1459_v28  ;;  %2495 = vst [vmem:[%s3147_s9 + $0x78] sm:$0xff] %v2479_v27  }
 0x22f   : > { %v1555_v19 = vadd.f32 %v1554_v14, %v3318_v29  ;;  %v1623_v20 = vadd.f32 %v1622_v13, %v1592_v12  ;;  %v1596_v29 = vmul.f32 %v3327_v37, %v3327_v37  ;;  %v1610_v12 = vmul.f32 %v1477_v25, %v1477_v25 }
 0x230   : > { %v1611_v14 = vmul.f32 %v1478_v26, %v1478_v26 }
 0x231   : > { %v1624_v22 = vadd.f32 %v1623_v20, %v1593_v15  ;;  %v1556_v23 = vadd.f32 %v1555_v19, %v3322_v32 }
 0x233   : > { %v1557_v28 = vadd.f32 %v1556_v23, %v3325_v36  ;;  %v1625_v30 = vadd.f32 %v1624_v22, %v1594_v21 }
 0x235   : > { %v1626_v31 = vadd.f32 %v1625_v30, %v1595_v24  ;;  %v1558_v33 = vadd.f32 %v1557_v28, %v3327_v37  ;;  %v1600_v37 = vmul.f32 %v3341_v46, %v3341_v46 }
 0x237   : > { %v1559_v32 = vadd.f32 %v1558_v33, %v3329_v38  ;;  %v1627_v35 = vadd.f32 %v1626_v31, %v1596_v29  ;;  %v1601_v38 = vmul.f32 %v3343_v47, %v3343_v47 }
 0x239   : > { %v1628_v40 = vadd.f32 %v1627_v35, %v1597_v34  ;;  %v1560_v36 = vadd.f32 %v1559_v32, %v3336_v41  ;;  %v1602_v41 = vmul.f32 %v3351_v53, %v3351_v53 }
 0x23b   : > { %v1561_v43 = vadd.f32 %v1560_v36, %v3339_v45  ;;  %v1629_v44 = vadd.f32 %v1628_v40, %v1598_v39  ;;  %v1603_v45 = vmul.f32 %v3353_v54, %v3353_v54 }
 0x23d   : > { %v1630_v48 = vadd.f32 %v1629_v44, %v1599_v42  ;;  %v1562_v49 = vadd.f32 %v1561_v43, %v3341_v46 }
 0x23f   : > { %v1563_v50 = vadd.f32 %v1562_v49, %v3343_v47  ;;  %v1631_v51 = vadd.f32 %v1630_v48, %v1600_v37 }
 0x241   : > { %v1632_v52 = vadd.f32 %v1631_v51, %v1601_v38  ;;  %v1564_v55 = vadd.f32 %v1563_v50, %v3351_v53 }
 0x243   : > { %v1565_v56 = vadd.f32 %v1564_v55, %v3353_v54  ;;  %v1633_v57 = vadd.f32 %v1632_v52, %v1602_v41  ;;  %v1609_v54 = vmul.f32 %v1476_v17, %v1476_v17 }
 0x245   : > { %v1634_v46 = vadd.f32 %v1633_v57, %v1603_v45  ;;  %v1566_v59 = vadd.f32 %v1565_v56, %v1471_v62 }
 0x247   : > { %v1567_v47 = vadd.f32 %v1566_v59, %v3360_v63  ;;  %v1635_v61 = vadd.f32 %v1634_v46, %v1604_v58 }
 0x249   : > { %v1636_v1 = vadd.f32 %v1635_v61, %v1605_v60  ;;  %v1568_v2 = vadd.f32 %v1567_v47, %v1473_v7 }
 0x24b   : > { %v1569_v53 = vadd.f32 %v1568_v2, %v1474_v8  ;;  %v1637_v4 = vadd.f32 %v1636_v1, %v1606_v0 }
 0x24d   : > { %v1638_v6 = vadd.f32 %v1637_v4, %v1607_v3  ;;  %v1570_v9 = vadd.f32 %v1569_v53, %v1475_v16 }
 0x24f   : > { %v1571_v10 = vadd.f32 %v1570_v9, %v1476_v17  ;;  %v1639_v11 = vadd.f32 %v1638_v6, %v1608_v5 }
 0x251   : > { %v1640_v62 = vadd.f32 %v1639_v11, %v1609_v54  ;;  %v1572_v13 = vadd.f32 %v1571_v10, %v1477_v25 }
 0x253   : > { %v1573_v15 = vadd.f32 %v1572_v13, %v1478_v26  ;;  %v1641_v63 = vadd.f32 %v1640_v62, %v1610_v12 }
 0x255   : > { %v1574_v18 = vrot.slane %v1573_v15, 4  ;;  %v1642_v19 = vadd.f32 %v1641_v63, %v1611_v14 }
 0x257   : > { %v1575_v7 = vadd.f32 %v1574_v18, %v1573_v15  ;;  %v1643_v20 = vrot.slane %v1642_v19, 4 }
 0x259   : > { %v1576_v8 = vrot.slane %v1575_v7, 2  ;;  %v1644_v21 = vadd.f32 %v1643_v20, %v1642_v19 }
 0x25b   : > { %v1577_v22 = vadd.f32 %v1576_v8, %v1575_v7  ;;  %v1645_v23 = vrot.slane %v1644_v21, 2 }
 0x25d   : > { %v1578_v16 = vrot.slane %v1577_v22, 1  ;;  %v1646_v24 = vadd.f32 %v1645_v23, %v1644_v21 }
 0x25f   : > { %v1579_v17 = vadd.f32 %v1578_v16, %v1577_v22  ;;  %v1647_v27 = vrot.slane %v1646_v24, 1 }
 0x261   : > { %1649 = vst [vmem:[%s3149_s3] sm:$0xff] %v1579_v17  ;;  %v1648_v28 = vadd.f32 %v1647_v27, %v1646_v24 }
 0x263   : > { %1650 = vst [vmem:[%s3151_s21] sm:$0xff] %v1648_v28 }
 0x264 PF: > { %s3553_s24 = sld [smem:[#allocation19_spill]]  ;;  %s1656_s5 = sand.u32 1, %s3072_s7  }
 0x265   : > { %s3554_s4 = sld [smem:[#allocation29_spill]]  ;;  %s1693_s29 = sshll.u32 %s3149_s3, 4  ;;  %s1694_s29 = int_to_ptr.vmem [resolvable:$true] %s1693_s29 }
 0x266   : > { %s3411_s11 = scalar_lea.sflag [#allocation10], %s1656_s5 }
 0x26a   : > { %s2299_s8 = sshll.u32 %s3553_s24, 3 }
 0x26b   : > { %s1691_s2 = scalar_lea.hbm %s3554_s4, %s2299_s8  ;;  %s2726_s25 = scalar_lea.hbm %s3554_s4, 32 }
 0x26c   : > { %s1695_s0 = sshll.u32 %s1691_s2, 4  ;;  %s1696_s0 = int_to_ptr.hbm [resolvable:$true] %s1695_s0 }
 0x26d   : > { %s2720_s23 = sshra.s32 %s1696_s0, 4  ;;  %s2721_s23 = int_to_ptr.hbm [resolvable:$true] %s2720_s23 }
 0x26e   : > { %s2722_s27 = scalar_lea.hbm %s2721_s23, 8  ;;  %p2727_p8 = scmp.lt.s32.totalorder %s2721_s23, %s3554_s4 }
 0x26f   : > { %p2723_p3 = scmp.ne.s32.totalorder %s2721_s23, %s2722_s27  ;;  %p2728_p9 = scmp.lt.s32.totalorder %s2726_s25, %s2722_s27 }
 0x271   : > { %p2724_p4 = pnand %p2723_p3, %p3109_p6  ;;  %p2729_p10 = por %p2728_p9, %p2727_p8 }
 0x273   : > { %p2725_p7 = pneg %p2724_p4 }
 0x275   : > { %p2730_p5 = pnand %p2729_p10, %p2725_p7 }
 0x277   : > { %2733 = shalt.err (!%p2730_p5)
}
 0x278   : > { %2502 = dma.vmem_to_hbm [thread:$0]  (%p3109_p6), %s1694_s29, 128, %s1696_s0, %s3411_s11  }
 0x279   : > { %s2400_s3 = sshll.u32 %s3553_s24, 7  ;;  %s3555_s2 = sld [smem:[#allocation28_spill]] }
 0x27a   : > { %s1675_s7 = sshll.u32 %s3147_s9, 4  ;;  %s3556_s25 = sld [smem:[#allocation30_spill]]  ;;  %s1676_s7 = int_to_ptr.vmem [resolvable:$true] %s1675_s7 }
 0x27b   : > { %s1652_s22 = scalar_lea.sflag [#allocation5], %s3143_s26 }
 0x27f   : > { %s1674_s14 = scalar_lea.hbm %s3555_s2, %s2400_s3  ;;  %s2754_s0 = scalar_lea.hbm %s3555_s2, 512 }
 0x280   : > { %s1677_s1 = sshll.u32 %s1674_s14, 4  ;;  %s3557_s30 = smov %s3556_s25  ;;  %s1678_s1 = int_to_ptr.hbm [resolvable:$true] %s1677_s1 }
 0x281   : > { %s1706_s4 = scalar_lea.hbm %s3556_s25, %s2299_s8  ;;  %s2748_s10 = sshra.s32 %s1678_s1, 4  ;;  %s2749_s10 = int_to_ptr.hbm [resolvable:$true] %s2748_s10 }
 0x282   : > { %s2750_s20 = scalar_lea.hbm %s2749_s10, 128  ;;  %p2755_p12 = scmp.lt.s32.totalorder %s2749_s10, %s3555_s2 }
 0x283   : > { %p2751_p11 = scmp.ne.s32.totalorder %s2749_s10, %s2750_s20  ;;  %p2756_p1 = scmp.lt.s32.totalorder %s2754_s0, %s2750_s20 }
 0x285   : > { %p2752_p13 = pnand %p2751_p11, %p3109_p6  ;;  %p2757_p3 = por %p2756_p1, %p2755_p12 }
 0x287   : > { %p2753_p0 = pneg %p2752_p13 }
 0x289   : > { %p2758_p4 = pnand %p2757_p3, %p2753_p0 }
 0x28b   : > { %2761 = shalt.err (!%p2758_p4)
}
 0x28c   : > { %s2924_s26 = smov 64   ;;  %s2925_s8 = smov 4  }
 0x28d   : > { %2501 = dma.vmem_to_hbm [thread:$0]  (%p3109_p6), %s1676_s7, 2048, %s1678_s1, %s1652_s22, %s2924_s26, %s2924_s26, %s2925_s8  }
 0x28e   : > { %s1708_s5 = sshll.u32 %s3151_s21, 4  ;;  %s1710_s12 = sshll.u32 %s1706_s4, 4  ;;  %s1709_s5 = int_to_ptr.vmem [resolvable:$true] %s1708_s5  ;;  %s1711_s12 = int_to_ptr.hbm [resolvable:$true] %s1710_s12 }
 0x28f   : > { %s2776_s14 = sshra.s32 %s1711_s12, 4  ;;  %s2782_s27 = scalar_lea.hbm %s3557_s30, 32  ;;  %s2777_s14 = int_to_ptr.hbm [resolvable:$true] %s2776_s14 }
 0x290   : > { %s2778_s23 = scalar_lea.hbm %s2777_s14, 8  ;;  %p2783_p10 = scmp.lt.s32.totalorder %s2777_s14, %s3557_s30 }
 0x291   : > { %p2779_p7 = scmp.ne.s32.totalorder %s2777_s14, %s2778_s23  ;;  %p2784_p5 = scmp.lt.s32.totalorder %s2782_s27, %s2778_s23 }
 0x293   : > { %p2780_p8 = pnand %p2779_p7, %p3109_p6  ;;  %p2785_p11 = por %p2784_p5, %p2783_p10 }
 0x295   : > { %p2781_p9 = pneg %p2780_p8 }
 0x297   : > { %p2786_p13 = pnand %p2785_p11, %p2781_p9 }
 0x299   : > { %2789 = shalt.err (!%p2786_p13)
}
 0x29a   : > { %2503 = dma.vmem_to_hbm [thread:$0]  (%p3109_p6), %s1709_s5, 128, %s1711_s12, %s3411_s11  }
 0x29b PF: > { %p2525_p0 = scmp.ge.s32.totalorder %s2916_s28, 2  ;;  %s1722_s22 = sand.u32 1, %s2864_s15  }
 0x29c   : > { %s1723_s21 = scalar_lea.sflag [#allocation5], %s1722_s22 }
 0x29d   : > { %p2515_p12 = pnand %p2525_p0, %p3114_p2 }
 0x29f   : > { %p2516_p1 = pneg %p2515_p12 }
 0x2a1   : > { %2855 = dma.done.wait (%p2516_p1), %s1723_s21, 2048  }
 0x2a2   : > { %2857 = vsyncadd (%p2516_p1), %s1723_s21, 4294965248  ;;  %s3558_s4 = sadd.s32 4294967294, %s2916_s28  }
 0x2a3   : > { %s1732_s7 = sand.u32 1, %s3558_s4  }
 0x2a4   : > { %s1733_s1 = scalar_lea.sflag [#allocation10], %s1732_s7 }
 0x2a5   : > { %2859 = dma.done.wait (%p2516_p1), %s1733_s1, 256  }
 0x2a6   : > { %2861 = vsyncadd (%p2516_p1), %s1733_s1, 4294967040  ;;  %s27_s28 = sadd.s32 1, %s2916_s28   ;;  %s3560_s6 = sld [smem:[#allocation16_spill]] }
 0x2a7   : > { %p3462_p6 = scmp.ge.s32.totalorder %s27_s28, 14   ;;  %s3561_s20 = sld [smem:[#allocation25_spill]] }
 0x2a8   : > { %s3562_s21 = sld [smem:[#allocation17_spill]]  ;;  %s3570_s15 = smov %s2868_s16 }
 0x2a9   : > { %s3563_s22 = sld [smem:[#allocation18_spill]]  ;;  %s3571_s16 = smov %s2872_s17 }
 0x2aa   : > { %s3564_s23 = sld [smem:[#allocation24_spill]]  ;;  %s3572_s17 = smov %s3051_s13 }
 0x2ab   : > { %s3565_s24 = sld [smem:[#allocation20_spill]]  ;;  %s3573_s18 = smov %s2880_s19 }
 0x2ac   : > { %s3566_s25 = sld [smem:[#allocation21_spill]]  ;;  %s3574_s19 = smov %s3560_s6 }
 0x2ad   : > { %s3567_s26 = sld [smem:[#allocation22_spill]]  ;;  %26 = sbr.rel (!%p3462_p6) target bundleno = 20 (0x14), region = 126 }
 0x2ae   : > { %s3568_s27 = sld [smem:[#allocation23_spill]] }
 0x2b2   :  { %1749 = vsyncpa [#allocation4], 1 }
 0x2b3   :  { %1751 = vsyncpa [#allocation4 + $0x1], 1 }
 0x2b4   :  { %1752 = vsyncpa [#allocation7], 1 }
 0x2b5   :  { %1754 = vsyncpa [#allocation7 + $0x1], 1 }
 0x2b6   :  { %1755 = vsyncpa [#allocation5], 1 }
 0x2b7   :  { %1757 = vsyncpa [#allocation5 + $0x1], 1 }
 0x2b8   :  { %1758 = vsyncpa [#allocation10], 1 }
 0x2b9   :  { %1760 = vsyncpa [#allocation10 + $0x1], 1 }

</bundles_post_ra>
